<compile_context>
chip_gen: v6e
topology: v6e:2x2x1
jax: 0.10.0
libtpu: 0.0.40
codegen_flags: <defaults>
</compile_context>

<pallas_src>
import functools
import math

import jax
import jax.numpy as jnp
from jax.experimental import pallas as pl
from jax.experimental.pallas import tpu as pltpu


def _bilstm_chunk_kernel(len_ref, gxf_ref, gxb_ref, whhf_ref, whhb_ref,
                         out_f_ref, out_b_ref, hn_ref,
                         hf_scr, cf_scr, hb_scr, cb_scr,
                         *, hidden, chunk, t_total):
    """One grid step = `chunk` timesteps of both LSTM directions of one layer.

    Layout:
      gxf_ref / gxb_ref : (Tc, B, 4H) bf16  precomputed x@W_ih + b, cols [i f o g]
                          (gxb block is mapped to the mirrored time chunk)
      whhf_ref/whhb_ref : (H, 4H)     bf16  recurrent weights, cols [i f o g]
      len_ref           : (B, 1)      int32 sequence lengths
      out_f_ref/out_b_ref : (Tc, B, H) bf16 hidden outputs (bwd uses mirrored chunk)
      hn_ref            : (2, B, H)   f32   final hidden [fwd, bwd], written last step
      *_scr             : (B, H)      f32   persistent h/c state per direction
    """
    s = pl.program_id(0)
    n_s = pl.num_programs(0)
    H = hidden

    @pl.when(s == 0)
    def _init():
        hf_scr[...] = jnp.zeros_like(hf_scr)
        cf_scr[...] = jnp.zeros_like(cf_scr)
        hb_scr[...] = jnp.zeros_like(hb_scr)
        cb_scr[...] = jnp.zeros_like(cb_scr)

    lengths = len_ref[...]                    # (B, 1) int32  (hoisted)
    whh_f = whhf_ref[...]                     # (H, 4H) bf16  (hoisted)
    whh_b = whhb_ref[...]
    t0 = s * chunk                            # first fwd time of this chunk
    tb0 = t_total - 1 - t0                    # first bwd time of this chunk

    def lstm_cell(gates, c):
        # gates: (B, 4H) f32, columns [i | f | o | g]; c: (B, H) f32
        sig = jax.nn.sigmoid(gates[:, :3 * H])     # EUP: 3H lanes (i, f, o)
        g_g = jnp.tanh(gates[:, 3 * H:])           # EUP: H lanes (g)
        i_g = sig[:, :H]
        f_g = sig[:, H:2 * H]
        o_g = sig[:, 2 * H:3 * H]
        c_new = f_g * c + i_g * g_g
        h_new = o_g * jnp.tanh(c_new)              # EUP: H lanes
        return h_new, c_new

    def step(j, carry):
        h_f, c_f, h_b, c_b = carry                 # each (B, H) f32

        # ---------------- forward direction ----------------
        gates_f = gxf_ref[j].astype(jnp.float32) + jnp.dot(
            h_f.astype(jnp.bfloat16), whh_f, preferred_element_type=jnp.float32)
        hn_f, cn_f = lstm_cell(gates_f, c_f)
        valid_f = (t0 + j) < lengths               # (B, 1) bool
        h_f = jnp.where(valid_f, hn_f, h_f)
        c_f = jnp.where(valid_f, cn_f, c_f)
        out_f_ref[j] = jnp.where(valid_f, hn_f, 0.0).astype(out_f_ref.dtype)

        # ---------------- backward direction (reversed time) ----------------
        gates_b = gxb_ref[chunk - 1 - j].astype(jnp.float32) + jnp.dot(
            h_b.astype(jnp.bfloat16), whh_b, preferred_element_type=jnp.float32)
        hn_b, cn_b = lstm_cell(gates_b, c_b)
        valid_b = (tb0 - j) < lengths
        h_b = jnp.where(valid_b, hn_b, h_b)
        c_b = jnp.where(valid_b, cn_b, c_b)
        out_b_ref[chunk - 1 - j] = jnp.where(valid_b, hn_b, 0.0).astype(out_b_ref.dtype)

        return h_f, c_f, h_b, c_b

    h_f, c_f, h_b, c_b = jax.lax.fori_loop(
        0, chunk, step,
        (hf_scr[...], cf_scr[...], hb_scr[...], cb_scr[...]),
        unroll=True)
    hf_scr[...] = h_f
    cf_scr[...] = c_f
    hb_scr[...] = h_b
    cb_scr[...] = c_b

    @pl.when(s == n_s - 1)
    def _finalize():
        hn_ref[0] = h_f
        hn_ref[1] = h_b


def run_bilstm_layer(lengths_b1, gx_f, gx_b, whh_f, whh_b, *, hidden, chunk):
    """gx_f/gx_b: (T_pad, B, 4H) bf16 gate streams (natural time order).

    Returns (out_fwd (T_pad,B,H) bf16, out_bwd (T_pad,B,H) bf16, h_n (2,B,H) f32).
    """
    T_pad, B, G = gx_f.shape
    H = hidden
    assert G == 4 * H and T_pad % chunk == 0
    n_chunks = T_pad // chunk

    kernel = functools.partial(_bilstm_chunk_kernel,
                               hidden=H, chunk=chunk, t_total=T_pad)

    # Explicit scoped-VMEM budget (double-buffered chunks + weights + state).
    vmem_need = (2 * 2 * chunk * B * 4 * H * 2     # gx_f, gx_b chunks (bf16)
                 + 2 * 2 * chunk * B * H * 2       # out_f, out_b chunks (bf16)
                 + 2 * 2 * H * 4 * H * 2           # recurrent weights (bf16)
                 + 4 * B * H * 4                   # state scratch (f32)
                 + 2 * 2 * B * H * 4               # h_n output (f32)
                 + (1 << 16))                      # slack
    vmem_limit = int(min(max(2 * vmem_need, 16 * 2**20), 64 * 2**20))

    out_f, out_b, hn = pl.pallas_call(
        kernel,
        grid=(n_chunks,),
        in_specs=[
            pl.BlockSpec((B, 1), lambda s: (0, 0)),                        # lengths
            pl.BlockSpec((chunk, B, 4 * H), lambda s: (s, 0, 0)),          # fwd gates
            pl.BlockSpec((chunk, B, 4 * H),                                # bwd gates,
                         lambda s: (n_chunks - 1 - s, 0, 0)),              # mirrored chunk
            pl.BlockSpec((H, 4 * H), lambda s: (0, 0)),                    # W_hh fwd
            pl.BlockSpec((H, 4 * H), lambda s: (0, 0)),                    # W_hh bwd
        ],
        out_specs=[
            pl.BlockSpec((chunk, B, H), lambda s: (s, 0, 0)),              # fwd out
            pl.BlockSpec((chunk, B, H), lambda s: (n_chunks - 1 - s, 0, 0)),  # bwd out
            pl.BlockSpec((2, B, H), lambda s: (0, 0, 0)),                  # h_n
        ],
        out_shape=[
            jax.ShapeDtypeStruct((T_pad, B, H), jnp.bfloat16),
            jax.ShapeDtypeStruct((T_pad, B, H), jnp.bfloat16),
            jax.ShapeDtypeStruct((2, B, H), jnp.float32),
        ],
        scratch_shapes=[pltpu.VMEM((B, H), jnp.float32)] * 4,
        compiler_params=pltpu.CompilerParams(
            dimension_semantics=("arbitrary",),      # sequential recurrence
            vmem_limit_bytes=vmem_limit),
    )(lengths_b1, gx_f, gx_b, whh_f, whh_b)
    return out_f, out_b, hn


def _project(parts, wihT_bf16, bias_f32):
    """Hoisted time-invariant input GEMM: sum_i parts[i] @ wihT[rows_i] + bias.

    `parts` are the feature-dim pieces whose concat is the layer input (so the
    per-layer concatenate of (out_fwd, out_bwd) is never materialized).
    Returns a bf16 gate stream (T, B, 4H) in [i | f | o | g] column order.
    """
    acc = None
    off = 0
    for p in parts:
        d = p.shape[-1]
        contrib = jnp.einsum('tbd,dg->tbg', p, wihT_bf16[off:off + d, :],
                             preferred_element_type=jnp.float32)
        acc = contrib if acc is None else acc + contrib
        off += d
    return (acc + bias_f32).astype(jnp.bfloat16)


class RNNEncoderPallas:
    """Pallas port of the PyTorch RNNEncoder (bidirectional LSTM, batch_first)."""

    def __init__(self, input_size, hidden_size, num_layers, drop_prob=0.0,
                 key=None):
        if key is None:
            key = jax.random.PRNGKey(0)
        self.input_size = input_size
        self.hidden_size = hidden_size
        self.num_layers = num_layers
        self.drop_prob = drop_prob

        H = hidden_size
        bound = 1.0 / math.sqrt(H)
        # PyTorch gate row order is [i, f, g, o]; kernel wants [i, f, o, g]
        # (sigmoid gates contiguous in the first 3H columns).
        perm = jnp.concatenate([jnp.arange(0, 2 * H),
                                jnp.arange(3 * H, 4 * H),
                                jnp.arange(2 * H, 3 * H)])

        self.params = []   # raw f32 PyTorch-layout params (for the reference)
        self.layers = []   # precomputed kernel-layout params
        for layer in range(num_layers):
            in_sz = input_size if layer == 0 else 2 * hidden_size
            raw = []
            for _ in range(2):  # forward, backward
                key, k1, k2, k3, k4 = jax.random.split(key, 5)
                w_ih = jax.random.uniform(k1, (4 * H, in_sz), jnp.float32, -bound, bound)
                w_hh = jax.random.uniform(k2, (4 * H, H), jnp.float32, -bound, bound)
                b_ih = jax.random.uniform(k3, (4 * H,), jnp.float32, -bound, bound)
                b_hh = jax.random.uniform(k4, (4 * H,), jnp.float32, -bound, bound)
                raw.append((w_ih, w_hh, b_ih, b_hh))
            self.params.append(raw)

            prepped = []
            for (w_ih, w_hh, b_ih, b_hh) in raw:
                wihT = w_ih[perm].T.astype(jnp.bfloat16)     # (in, 4H), [i f o g] cols
                whhT = w_hh[perm].T.astype(jnp.bfloat16)     # (H, 4H)
                bias = (b_ih + b_hh)[perm]                   # (4H,) f32, pre-summed
                prepped.append((wihT, whhT, bias))
            self.layers.append(prepped)

    def __call__(self, x, lengths, time_chunk=32):
        """x: (B, T, D) f32, lengths: (B,) int -> (out (B,T,2H) f32, h_n (2L,B,H) f32)."""
        B, T, _ = x.shape
        H = self.hidden_size
        Tc = max(1, min(time_chunk, T))
        T_pad = ((T + Tc - 1) // Tc) * Tc
        Bp = ((B + 7) // 8) * 8                    # pad batch to sublane multiple

        lengths_pad = jnp.zeros((Bp,), jnp.int32).at[:B].set(lengths.astype(jnp.int32))
        lengths_b1 = lengths_pad.reshape(Bp, 1)

        x_tbd = jnp.transpose(x, (1, 0, 2)).astype(jnp.float32)   # time-major (T,B,D)
        x_tbd = jnp.pad(x_tbd, ((0, T_pad - T), (0, Bp - B), (0, 0)))

        parts = [x_tbd.astype(jnp.bfloat16)]       # concat(parts, -1) == layer input
        hn_list = []
        out_f = out_b = None
        for layer in range(self.num_layers):
            (wihT_f, whhT_f, bias_f), (wihT_b, whhT_b, bias_b) = self.layers[layer]
            # hoisted input projections (one GEMM per direction, outside recurrence);
            # no wrapper-side reverse/interleave — the kernel mirrors the bwd chunks.
            gx_f = _project(parts, wihT_f, bias_f)                # (T_pad,Bp,4H) bf16
            gx_b = _project(parts, wihT_b, bias_b)

            out_f, out_b, hn = run_bilstm_layer(
                lengths_b1, gx_f, gx_b, whhT_f, whhT_b, hidden=H, chunk=Tc)
            hn_list.append(hn)                                    # (2, Bp, H) f32
            parts = [out_f, out_b]
            # TODO(synk): training-mode inter-layer dropout not implemented (identity here).

        out = jnp.concatenate([out_f[:T, :B], out_b[:T, :B]], axis=-1)  # (T,B,2H) bf16
        out = jnp.transpose(out, (1, 0, 2)).astype(jnp.float32)         # (B,T,2H) f32
        h_n = jnp.concatenate(hn_list, axis=0)[:, :B]                   # (2L,B,H) f32
        # final F.dropout with training=False -> identity
        return out, h_n


# ----------------------------- pure-JAX reference -----------------------------
# Mirrors the kernel numerics: bf16 matmul operands with f32 accumulation, bf16
# gate streams, bf16 inter-layer hidden streams, f32 state.
def _ref_lstm_dir(x_tbd_bf16, lengths, w_ih, w_hh, b_ih, b_hh, reverse):
    T, B, _ = x_tbd_bf16.shape
    H = w_hh.shape[1]
    gx = jnp.einsum('tbd,dg->tbg', x_tbd_bf16, w_ih.T.astype(jnp.bfloat16),
                    preferred_element_type=jnp.float32) + (b_ih + b_hh)
    gx = gx.astype(jnp.bfloat16).astype(jnp.float32)   # kernel streams gates in bf16
    whh_t = w_hh.T.astype(jnp.bfloat16)

    def step(carry, s):
        h, c = carry
        t = T - 1 - s if reverse else s
        gates = gx[t] + jnp.dot(h.astype(jnp.bfloat16), whh_t,
                                preferred_element_type=jnp.float32)
        i = jax.nn.sigmoid(gates[:, :H])
        f = jax.nn.sigmoid(gates[:, H:2 * H])
        g = jnp.tanh(gates[:, 2 * H:3 * H])
        o = jax.nn.sigmoid(gates[:, 3 * H:])
        c_new = f * c + i * g
        h_new = o * jnp.tanh(c_new)
        valid = (t < lengths)[:, None]
        h2 = jnp.where(valid, h_new, h)
        c2 = jnp.where(valid, c_new, c)
        out = jnp.where(valid, h_new, 0.0)
        return (h2, c2), out

    init = (jnp.zeros((B, H), jnp.float32), jnp.zeros((B, H), jnp.float32))
    (h_fin, _), outs = jax.lax.scan(step, init, jnp.arange(T))
    if reverse:
        outs = outs[::-1]
    return outs.astype(jnp.bfloat16), h_fin


def _ref_encoder(enc, x, lengths):
    x_cur = jnp.transpose(x, (1, 0, 2)).astype(jnp.bfloat16)
    hn_list = []
    for layer in range(enc.num_layers):
        outs = []
        for d, reverse in enumerate((False, True)):
            w_ih, w_hh, b_ih, b_hh = enc.params[layer][d]
            o, h = _ref_lstm_dir(x_cur, lengths, w_ih, w_hh, b_ih, b_hh, reverse)
            outs.append(o)
            hn_list.append(h)
        x_cur = jnp.concatenate(outs, axis=-1)
    out = jnp.transpose(x_cur, (1, 0, 2)).astype(jnp.float32)
    return out, jnp.stack(hn_list, axis=0)


if __name__ == "__main__":
    B, T, D, H, L = 2, 8, 16, 32, 2

    key = jax.random.PRNGKey(0)
    kx, kp = jax.random.split(key)
    x = jax.random.normal(kx, (B, T, D), jnp.float32)
    lengths = jnp.array([8, 5], dtype=jnp.int32)

    enc = RNNEncoderPallas(input_size=D, hidden_size=H, num_layers=L,
                           drop_prob=0.0, key=kp)

    out, h_n = enc(x, lengths)
    out = jax.block_until_ready(out)
    h_n = jax.block_until_ready(h_n)

    assert out.shape == (B, T, 2 * H)
    assert h_n.shape == (2 * L, B, H)

    ref_out, ref_hn = _ref_encoder(enc, x, lengths)
    assert jnp.allclose(out, ref_out, atol=1e-2, rtol=1e-2)
    assert jnp.allclose(h_n, ref_hn, atol=1e-2, rtol=1e-2)

    print("KERNEL_OK")
</pallas_src>

<mosaic_0001>
module attributes {stable_mosaic.version = 11 : i64} {
  func.func @_bilstm_chunk_kernel(%arg0: i32, %arg1: memref<8x1xi32, #tpu.memory_space<vmem>>, %arg2: memref<8x8x128xbf16, #tpu.memory_space<vmem>>, %arg3: memref<8x8x128xbf16, #tpu.memory_space<vmem>>, %arg4: memref<32x128xbf16, #tpu.memory_space<vmem>>, %arg5: memref<32x128xbf16, #tpu.memory_space<vmem>>, %arg6: memref<8x8x32xbf16, #tpu.memory_space<vmem>>, %arg7: memref<8x8x32xbf16, #tpu.memory_space<vmem>>, %arg8: memref<2x8x32xf32, #tpu.memory_space<vmem>>, %arg9: memref<8x32xf32, #tpu.memory_space<vmem>>, %arg10: memref<8x32xf32, #tpu.memory_space<vmem>>, %arg11: memref<8x32xf32, #tpu.memory_space<vmem>>, %arg12: memref<8x32xf32, #tpu.memory_space<vmem>>) attributes {dimension_semantics = [#tpu.dimension_semantics<arbitrary>], iteration_bounds = array<i64: 1>, scalar_prefetch = 0 : i64, scratch_operands = 4 : i64, tpu.core_type = #tpu.core_type<tc>, window_params = [{pipeline_mode = #tpu.pipeline_mode<synchronous>, transform_indices = @transform_0, window_bounds = array<i64: 8, 1>}, {transform_indices = @transform_1, window_bounds = array<i64: 8, 8, 128>}, {transform_indices = @transform_2, window_bounds = array<i64: 8, 8, 128>}, {pipeline_mode = #tpu.pipeline_mode<synchronous>, transform_indices = @transform_3, window_bounds = array<i64: 32, 128>}, {pipeline_mode = #tpu.pipeline_mode<synchronous>, transform_indices = @transform_4, window_bounds = array<i64: 32, 128>}, {transform_indices = @transform_5, window_bounds = array<i64: 8, 8, 32>}, {transform_indices = @transform_6, window_bounds = array<i64: 8, 8, 32>}, {pipeline_mode = #tpu.pipeline_mode<synchronous>, transform_indices = @transform_7, window_bounds = array<i64: 2, 8, 32>}]} {
    %c0_i32 = arith.constant 0 : i32
    %0 = arith.cmpi eq, %arg0, %c0_i32 : i32
    %1 = arith.extui %0 : i1 to i32
    %c0_i32_0 = arith.constant 0 : i32
    %2 = arith.cmpi ne, %1, %c0_i32_0 : i32
    scf.if %2 {
      %cst_154 = arith.constant 0.000000e+00 : f32
      %691 = vector.broadcast %cst_154 : f32 to vector<8x32xf32>
      %c0_155 = arith.constant 0 : index
      %c0_156 = arith.constant 0 : index
      %692 = vector.load %arg9[%c0_155, %c0_156] : memref<8x32xf32, #tpu.memory_space<vmem>>, vector<8x32xf32>
      tpu.vector_store %arg9[%c0_155, %c0_156], %691 {strides = array<i32>} : memref<8x32xf32, #tpu.memory_space<vmem>>, vector<8x32xf32>,
      %cst_157 = arith.constant 0.000000e+00 : f32
      %693 = vector.broadcast %cst_157 : f32 to vector<8x32xf32>
      %c0_158 = arith.constant 0 : index
      %c0_159 = arith.constant 0 : index
      %694 = vector.load %arg10[%c0_158, %c0_159] : memref<8x32xf32, #tpu.memory_space<vmem>>, vector<8x32xf32>
      tpu.vector_store %arg10[%c0_158, %c0_159], %693 {strides = array<i32>} : memref<8x32xf32, #tpu.memory_space<vmem>>, vector<8x32xf32>,
      %cst_160 = arith.constant 0.000000e+00 : f32
      %695 = vector.broadcast %cst_160 : f32 to vector<8x32xf32>
      %c0_161 = arith.constant 0 : index
      %c0_162 = arith.constant 0 : index
      %696 = vector.load %arg11[%c0_161, %c0_162] : memref<8x32xf32, #tpu.memory_space<vmem>>, vector<8x32xf32>
      tpu.vector_store %arg11[%c0_161, %c0_162], %695 {strides = array<i32>} : memref<8x32xf32, #tpu.memory_space<vmem>>, vector<8x32xf32>,
      %cst_163 = arith.constant 0.000000e+00 : f32
      %697 = vector.broadcast %cst_163 : f32 to vector<8x32xf32>
      %c0_164 = arith.constant 0 : index
      %c0_165 = arith.constant 0 : index
      %698 = vector.load %arg12[%c0_164, %c0_165] : memref<8x32xf32, #tpu.memory_space<vmem>>, vector<8x32xf32>
      tpu.vector_store %arg12[%c0_164, %c0_165], %697 {strides = array<i32>} : memref<8x32xf32, #tpu.memory_space<vmem>>, vector<8x32xf32>,
    } else {
    }
    %c0 = arith.constant 0 : index
    %c0_1 = arith.constant 0 : index
    %3 = vector.load %arg1[%c0, %c0_1] : memref<8x1xi32, #tpu.memory_space<vmem>>, vector<8x1xi32>
    %c0_2 = arith.constant 0 : index
    %c0_3 = arith.constant 0 : index
    %4 = vector.load %arg4[%c0_2, %c0_3] : memref<32x128xbf16, #tpu.memory_space<vmem>>, vector<32x128xbf16>
    %c0_4 = arith.constant 0 : index
    %c0_5 = arith.constant 0 : index
    %5 = vector.load %arg5[%c0_4, %c0_5] : memref<32x128xbf16, #tpu.memory_space<vmem>>, vector<32x128xbf16>
    %c8_i32 = arith.constant 8 : i32
    %6 = arith.muli %arg0, %c8_i32 : i32
    %c7_i32 = arith.constant 7 : i32
    %7 = arith.subi %c7_i32, %6 : i32
    %c0_6 = arith.constant 0 : index
    %c0_7 = arith.constant 0 : index
    %8 = vector.load %arg9[%c0_6, %c0_7] : memref<8x32xf32, #tpu.memory_space<vmem>>, vector<8x32xf32>
    %c0_8 = arith.constant 0 : index
    %c0_9 = arith.constant 0 : index
    %9 = vector.load %arg10[%c0_8, %c0_9] : memref<8x32xf32, #tpu.memory_space<vmem>>, vector<8x32xf32>
    %c0_10 = arith.constant 0 : index
    %c0_11 = arith.constant 0 : index
    %10 = vector.load %arg11[%c0_10, %c0_11] : memref<8x32xf32, #tpu.memory_space<vmem>>, vector<8x32xf32>
    %c0_12 = arith.constant 0 : index
    %c0_13 = arith.constant 0 : index
    %11 = vector.load %arg12[%c0_12, %c0_13] : memref<8x32xf32, #tpu.memory_space<vmem>>, vector<8x32xf32>
    %c0_i32_14 = arith.constant 0 : i32
    %12 = arith.index_cast %c0_i32_14 : i32 to index
    %c0_15 = arith.constant 0 : index
    %c0_16 = arith.constant 0 : index
    %13 = vector.load %arg2[%12, %c0_15, %c0_16] : memref<8x8x128xbf16, #tpu.memory_space<vmem>>, vector<1x8x128xbf16>
    %14 = vector.shape_cast %13 : vector<1x8x128xbf16> to vector<8x128xbf16>
    %15 = arith.extf %14 : vector<8x128xbf16> to vector<8x128xf32>
    %16 = arith.truncf %8 : vector<8x32xf32> to vector<8x32xbf16>
    %cst = arith.constant dense<0.000000e+00> : vector<8x128xf32>
    %17 = tpu.matmul %16, %4, %cst {dimension_numbers = #tpu.dot_dimension_numbers<[1], [0], [0], [1], [0, 0, 1, 1], [], []>} : vector<8x32xbf16>, vector<32x128xbf16>, vector<8x128xf32> -> vector<8x128xf32>
    %18 = arith.addf %15, %17 : vector<8x128xf32>
    %19 = vector.extract_strided_slice %18 {offsets = [0, 0], sizes = [8, 96], strides = [1, 1]} : vector<8x128xf32> to vector<8x96xf32>
    %20 = arith.negf %19 : vector<8x96xf32>
    %21 = math.exp %20 : vector<8x96xf32>
    %cst_17 = arith.constant 1.000000e+00 : f32
    %22 = vector.broadcast %cst_17 : f32 to vector<8x96xf32>
    %23 = arith.addf %22, %21 : vector<8x96xf32>
    %24 = arith.divf %22, %23 : vector<8x96xf32>
    %25 = vector.extract_strided_slice %18 {offsets = [0, 96], sizes = [8, 32], strides = [1, 1]} : vector<8x128xf32> to vector<8x32xf32>
    %26 = math.tanh %25 : vector<8x32xf32>
    %27 = vector.extract_strided_slice %24 {offsets = [0, 0], sizes = [8, 32], strides = [1, 1]} : vector<8x96xf32> to vector<8x32xf32>
    %28 = vector.extract_strided_slice %24 {offsets = [0, 32], sizes = [8, 32], strides = [1, 1]} : vector<8x96xf32> to vector<8x32xf32>
    %29 = vector.extract_strided_slice %24 {offsets = [0, 64], sizes = [8, 32], strides = [1, 1]} : vector<8x96xf32> to vector<8x32xf32>
    %30 = arith.mulf %28, %9 : vector<8x32xf32>
    %31 = arith.mulf %27, %26 : vector<8x32xf32>
    %32 = arith.addf %30, %31 : vector<8x32xf32>
    %33 = math.tanh %32 : vector<8x32xf32>
    %34 = arith.mulf %29, %33 : vector<8x32xf32>
    %35 = arith.addi %6, %c0_i32_14 : i32
    %36 = vector.broadcast %35 : i32 to vector<8x1xi32>
    %37 = arith.cmpi slt, %36, %3 : vector<8x1xi32>
    %38 = vector.shape_cast %37 : vector<8x1xi1> to vector<8x1xi1>
    %39 = vector.broadcast %38 : vector<8x1xi1> to vector<8x32xi1>
    %40 = arith.select %39, %34, %8 : vector<8x32xi1>, vector<8x32xf32>
    %41 = vector.shape_cast %37 : vector<8x1xi1> to vector<8x1xi1>
    %42 = vector.broadcast %41 : vector<8x1xi1> to vector<8x32xi1>
    %43 = arith.select %42, %32, %9 : vector<8x32xi1>, vector<8x32xf32>
    %cst_18 = arith.constant 0.000000e+00 : f32
    %44 = vector.shape_cast %37 : vector<8x1xi1> to vector<8x1xi1>
    %45 = vector.broadcast %44 : vector<8x1xi1> to vector<8x32xi1>
    %46 = vector.broadcast %cst_18 : f32 to vector<8x32xf32>
    %47 = arith.select %45, %34, %46 : vector<8x32xi1>, vector<8x32xf32>
    %48 = arith.truncf %47 : vector<8x32xf32> to vector<8x32xbf16>
    %49 = arith.index_cast %c0_i32_14 : i32 to index
    %c0_19 = arith.constant 0 : index
    %c0_20 = arith.constant 0 : index
    %50 = vector.load %arg6[%49, %c0_19, %c0_20] : memref<8x8x32xbf16, #tpu.memory_space<vmem>>, vector<1x8x32xbf16>
    %51 = vector.shape_cast %50 : vector<1x8x32xbf16> to vector<8x32xbf16>
    %52 = vector.shape_cast %48 : vector<8x32xbf16> to vector<1x8x32xbf16>
    tpu.vector_store %arg6[%49, %c0_19, %c0_20], %52 {strides = array<i32>} : memref<8x8x32xbf16, #tpu.memory_space<vmem>>, vector<1x8x32xbf16>,
    %c7_i32_21 = arith.constant 7 : i32
    %53 = arith.subi %c7_i32_21, %c0_i32_14 : i32
    %54 = arith.index_cast %53 : i32 to index
    %c0_22 = arith.constant 0 : index
    %c0_23 = arith.constant 0 : index
    %55 = vector.load %arg3[%54, %c0_22, %c0_23] : memref<8x8x128xbf16, #tpu.memory_space<vmem>>, vector<1x8x128xbf16>
    %56 = vector.shape_cast %55 : vector<1x8x128xbf16> to vector<8x128xbf16>
    %57 = arith.extf %56 : vector<8x128xbf16> to vector<8x128xf32>
    %58 = arith.truncf %10 : vector<8x32xf32> to vector<8x32xbf16>
    %cst_24 = arith.constant dense<0.000000e+00> : vector<8x128xf32>
    %59 = tpu.matmul %58, %5, %cst_24 {dimension_numbers = #tpu.dot_dimension_numbers<[1], [0], [0], [1], [0, 0, 1, 1], [], []>} : vector<8x32xbf16>, vector<32x128xbf16>, vector<8x128xf32> -> vector<8x128xf32>
    %60 = arith.addf %57, %59 : vector<8x128xf32>
    %61 = vector.extract_strided_slice %60 {offsets = [0, 0], sizes = [8, 96], strides = [1, 1]} : vector<8x128xf32> to vector<8x96xf32>
    %62 = arith.negf %61 : vector<8x96xf32>
    %63 = math.exp %62 : vector<8x96xf32>
    %cst_25 = arith.constant 1.000000e+00 : f32
    %64 = vector.broadcast %cst_25 : f32 to vector<8x96xf32>
    %65 = arith.addf %64, %63 : vector<8x96xf32>
    %66 = arith.divf %64, %65 : vector<8x96xf32>
    %67 = vector.extract_strided_slice %60 {offsets = [0, 96], sizes = [8, 32], strides = [1, 1]} : vector<8x128xf32> to vector<8x32xf32>
    %68 = math.tanh %67 : vector<8x32xf32>
    %69 = vector.extract_strided_slice %66 {offsets = [0, 0], sizes = [8, 32], strides = [1, 1]} : vector<8x96xf32> to vector<8x32xf32>
    %70 = vector.extract_strided_slice %66 {offsets = [0, 32], sizes = [8, 32], strides = [1, 1]} : vector<8x96xf32> to vector<8x32xf32>
    %71 = vector.extract_strided_slice %66 {offsets = [0, 64], sizes = [8, 32], strides = [1, 1]} : vector<8x96xf32> to vector<8x32xf32>
    %72 = arith.mulf %70, %11 : vector<8x32xf32>
    %73 = arith.mulf %69, %68 : vector<8x32xf32>
    %74 = arith.addf %72, %73 : vector<8x32xf32>
    %75 = math.tanh %74 : vector<8x32xf32>
    %76 = arith.mulf %71, %75 : vector<8x32xf32>
    %77 = arith.subi %7, %c0_i32_14 : i32
    %78 = vector.broadcast %77 : i32 to vector<8x1xi32>
    %79 = arith.cmpi slt, %78, %3 : vector<8x1xi32>
    %80 = vector.shape_cast %79 : vector<8x1xi1> to vector<8x1xi1>
    %81 = vector.broadcast %80 : vector<8x1xi1> to vector<8x32xi1>
    %82 = arith.select %81, %76, %10 : vector<8x32xi1>, vector<8x32xf32>
    %83 = vector.shape_cast %79 : vector<8x1xi1> to vector<8x1xi1>
    %84 = vector.broadcast %83 : vector<8x1xi1> to vector<8x32xi1>
    %85 = arith.select %84, %74, %11 : vector<8x32xi1>, vector<8x32xf32>
    %cst_26 = arith.constant 0.000000e+00 : f32
    %86 = vector.shape_cast %79 : vector<8x1xi1> to vector<8x1xi1>
    %87 = vector.broadcast %86 : vector<8x1xi1> to vector<8x32xi1>
    %88 = vector.broadcast %cst_26 : f32 to vector<8x32xf32>
    %89 = arith.select %87, %76, %88 : vector<8x32xi1>, vector<8x32xf32>
    %90 = arith.truncf %89 : vector<8x32xf32> to vector<8x32xbf16>
    %c7_i32_27 = arith.constant 7 : i32
    %91 = arith.subi %c7_i32_27, %c0_i32_14 : i32
    %92 = arith.index_cast %91 : i32 to index
    %c0_28 = arith.constant 0 : index
    %c0_29 = arith.constant 0 : index
    %93 = vector.load %arg7[%92, %c0_28, %c0_29] : memref<8x8x32xbf16, #tpu.memory_space<vmem>>, vector<1x8x32xbf16>
    %94 = vector.shape_cast %93 : vector<1x8x32xbf16> to vector<8x32xbf16>
    %95 = vector.shape_cast %90 : vector<8x32xbf16> to vector<1x8x32xbf16>
    tpu.vector_store %arg7[%92, %c0_28, %c0_29], %95 {strides = array<i32>} : memref<8x8x32xbf16, #tpu.memory_space<vmem>>, vector<1x8x32xbf16>,
    %c1_i32 = arith.constant 1 : i32
    %96 = arith.index_cast %c1_i32 : i32 to index
    %c0_30 = arith.constant 0 : index
    %c0_31 = arith.constant 0 : index
    %97 = vector.load %arg2[%96, %c0_30, %c0_31] : memref<8x8x128xbf16, #tpu.memory_space<vmem>>, vector<1x8x128xbf16>
    %98 = vector.shape_cast %97 : vector<1x8x128xbf16> to vector<8x128xbf16>
    %99 = arith.extf %98 : vector<8x128xbf16> to vector<8x128xf32>
    %100 = arith.truncf %40 : vector<8x32xf32> to vector<8x32xbf16>
    %cst_32 = arith.constant dense<0.000000e+00> : vector<8x128xf32>
    %101 = tpu.matmul %100, %4, %cst_32 {dimension_numbers = #tpu.dot_dimension_numbers<[1], [0], [0], [1], [0, 0, 1, 1], [], []>} : vector<8x32xbf16>, vector<32x128xbf16>, vector<8x128xf32> -> vector<8x128xf32>
    %102 = arith.addf %99, %101 : vector<8x128xf32>
    %103 = vector.extract_strided_slice %102 {offsets = [0, 0], sizes = [8, 96], strides = [1, 1]} : vector<8x128xf32> to vector<8x96xf32>
    %104 = arith.negf %103 : vector<8x96xf32>
    %105 = math.exp %104 : vector<8x96xf32>
    %cst_33 = arith.constant 1.000000e+00 : f32
    %106 = vector.broadcast %cst_33 : f32 to vector<8x96xf32>
    %107 = arith.addf %106, %105 : vector<8x96xf32>
    %108 = arith.divf %106, %107 : vector<8x96xf32>
    %109 = vector.extract_strided_slice %102 {offsets = [0, 96], sizes = [8, 32], strides = [1, 1]} : vector<8x128xf32> to vector<8x32xf32>
    %110 = math.tanh %109 : vector<8x32xf32>
    %111 = vector.extract_strided_slice %108 {offsets = [0, 0], sizes = [8, 32], strides = [1, 1]} : vector<8x96xf32> to vector<8x32xf32>
    %112 = vector.extract_strided_slice %108 {offsets = [0, 32], sizes = [8, 32], strides = [1, 1]} : vector<8x96xf32> to vector<8x32xf32>
    %113 = vector.extract_strided_slice %108 {offsets = [0, 64], sizes = [8, 32], strides = [1, 1]} : vector<8x96xf32> to vector<8x32xf32>
    %114 = arith.mulf %112, %43 : vector<8x32xf32>
    %115 = arith.mulf %111, %110 : vector<8x32xf32>
    %116 = arith.addf %114, %115 : vector<8x32xf32>
    %117 = math.tanh %116 : vector<8x32xf32>
    %118 = arith.mulf %113, %117 : vector<8x32xf32>
    %119 = arith.addi %6, %c1_i32 : i32
    %120 = vector.broadcast %119 : i32 to vector<8x1xi32>
    %121 = arith.cmpi slt, %120, %3 : vector<8x1xi32>
    %122 = vector.shape_cast %121 : vector<8x1xi1> to vector<8x1xi1>
    %123 = vector.broadcast %122 : vector<8x1xi1> to vector<8x32xi1>
    %124 = arith.select %123, %118, %40 : vector<8x32xi1>, vector<8x32xf32>
    %125 = vector.shape_cast %121 : vector<8x1xi1> to vector<8x1xi1>
    %126 = vector.broadcast %125 : vector<8x1xi1> to vector<8x32xi1>
    %127 = arith.select %126, %116, %43 : vector<8x32xi1>, vector<8x32xf32>
    %cst_34 = arith.constant 0.000000e+00 : f32
    %128 = vector.shape_cast %121 : vector<8x1xi1> to vector<8x1xi1>
    %129 = vector.broadcast %128 : vector<8x1xi1> to vector<8x32xi1>
    %130 = vector.broadcast %cst_34 : f32 to vector<8x32xf32>
    %131 = arith.select %129, %118, %130 : vector<8x32xi1>, vector<8x32xf32>
    %132 = arith.truncf %131 : vector<8x32xf32> to vector<8x32xbf16>
    %133 = arith.index_cast %c1_i32 : i32 to index
    %c0_35 = arith.constant 0 : index
    %c0_36 = arith.constant 0 : index
    %134 = vector.load %arg6[%133, %c0_35, %c0_36] : memref<8x8x32xbf16, #tpu.memory_space<vmem>>, vector<1x8x32xbf16>
    %135 = vector.shape_cast %134 : vector<1x8x32xbf16> to vector<8x32xbf16>
    %136 = vector.shape_cast %132 : vector<8x32xbf16> to vector<1x8x32xbf16>
    tpu.vector_store %arg6[%133, %c0_35, %c0_36], %136 {strides = array<i32>} : memref<8x8x32xbf16, #tpu.memory_space<vmem>>, vector<1x8x32xbf16>,
    %c7_i32_37 = arith.constant 7 : i32
    %137 = arith.subi %c7_i32_37, %c1_i32 : i32
    %138 = arith.index_cast %137 : i32 to index
    %c0_38 = arith.constant 0 : index
    %c0_39 = arith.constant 0 : index
    %139 = vector.load %arg3[%138, %c0_38, %c0_39] : memref<8x8x128xbf16, #tpu.memory_space<vmem>>, vector<1x8x128xbf16>
    %140 = vector.shape_cast %139 : vector<1x8x128xbf16> to vector<8x128xbf16>
    %141 = arith.extf %140 : vector<8x128xbf16> to vector<8x128xf32>
    %142 = arith.truncf %82 : vector<8x32xf32> to vector<8x32xbf16>
    %cst_40 = arith.constant dense<0.000000e+00> : vector<8x128xf32>
    %143 = tpu.matmul %142, %5, %cst_40 {dimension_numbers = #tpu.dot_dimension_numbers<[1], [0], [0], [1], [0, 0, 1, 1], [], []>} : vector<8x32xbf16>, vector<32x128xbf16>, vector<8x128xf32> -> vector<8x128xf32>
    %144 = arith.addf %141, %143 : vector<8x128xf32>
    %145 = vector.extract_strided_slice %144 {offsets = [0, 0], sizes = [8, 96], strides = [1, 1]} : vector<8x128xf32> to vector<8x96xf32>
    %146 = arith.negf %145 : vector<8x96xf32>
    %147 = math.exp %146 : vector<8x96xf32>
    %cst_41 = arith.constant 1.000000e+00 : f32
    %148 = vector.broadcast %cst_41 : f32 to vector<8x96xf32>
    %149 = arith.addf %148, %147 : vector<8x96xf32>
    %150 = arith.divf %148, %149 : vector<8x96xf32>
    %151 = vector.extract_strided_slice %144 {offsets = [0, 96], sizes = [8, 32], strides = [1, 1]} : vector<8x128xf32> to vector<8x32xf32>
    %152 = math.tanh %151 : vector<8x32xf32>
    %153 = vector.extract_strided_slice %150 {offsets = [0, 0], sizes = [8, 32], strides = [1, 1]} : vector<8x96xf32> to vector<8x32xf32>
    %154 = vector.extract_strided_slice %150 {offsets = [0, 32], sizes = [8, 32], strides = [1, 1]} : vector<8x96xf32> to vector<8x32xf32>
    %155 = vector.extract_strided_slice %150 {offsets = [0, 64], sizes = [8, 32], strides = [1, 1]} : vector<8x96xf32> to vector<8x32xf32>
    %156 = arith.mulf %154, %85 : vector<8x32xf32>
    %157 = arith.mulf %153, %152 : vector<8x32xf32>
    %158 = arith.addf %156, %157 : vector<8x32xf32>
    %159 = math.tanh %158 : vector<8x32xf32>
    %160 = arith.mulf %155, %159 : vector<8x32xf32>
    %161 = arith.subi %7, %c1_i32 : i32
    %162 = vector.broadcast %161 : i32 to vector<8x1xi32>
    %163 = arith.cmpi slt, %162, %3 : vector<8x1xi32>
    %164 = vector.shape_cast %163 : vector<8x1xi1> to vector<8x1xi1>
    %165 = vector.broadcast %164 : vector<8x1xi1> to vector<8x32xi1>
    %166 = arith.select %165, %160, %82 : vector<8x32xi1>, vector<8x32xf32>
    %167 = vector.shape_cast %163 : vector<8x1xi1> to vector<8x1xi1>
    %168 = vector.broadcast %167 : vector<8x1xi1> to vector<8x32xi1>
    %169 = arith.select %168, %158, %85 : vector<8x32xi1>, vector<8x32xf32>
    %cst_42 = arith.constant 0.000000e+00 : f32
    %170 = vector.shape_cast %163 : vector<8x1xi1> to vector<8x1xi1>
    %171 = vector.broadcast %170 : vector<8x1xi1> to vector<8x32xi1>
    %172 = vector.broadcast %cst_42 : f32 to vector<8x32xf32>
    %173 = arith.select %171, %160, %172 : vector<8x32xi1>, vector<8x32xf32>
    %174 = arith.truncf %173 : vector<8x32xf32> to vector<8x32xbf16>
    %c7_i32_43 = arith.constant 7 : i32
    %175 = arith.subi %c7_i32_43, %c1_i32 : i32
    %176 = arith.index_cast %175 : i32 to index
    %c0_44 = arith.constant 0 : index
    %c0_45 = arith.constant 0 : index
    %177 = vector.load %arg7[%176, %c0_44, %c0_45] : memref<8x8x32xbf16, #tpu.memory_space<vmem>>, vector<1x8x32xbf16>
    %178 = vector.shape_cast %177 : vector<1x8x32xbf16> to vector<8x32xbf16>
    %179 = vector.shape_cast %174 : vector<8x32xbf16> to vector<1x8x32xbf16>
    tpu.vector_store %arg7[%176, %c0_44, %c0_45], %179 {strides = array<i32>} : memref<8x8x32xbf16, #tpu.memory_space<vmem>>, vector<1x8x32xbf16>,
    %c2_i32 = arith.constant 2 : i32
    %180 = arith.index_cast %c2_i32 : i32 to index
    %c0_46 = arith.constant 0 : index
    %c0_47 = arith.constant 0 : index
    %181 = vector.load %arg2[%180, %c0_46, %c0_47] : memref<8x8x128xbf16, #tpu.memory_space<vmem>>, vector<1x8x128xbf16>
    %182 = vector.shape_cast %181 : vector<1x8x128xbf16> to vector<8x128xbf16>
    %183 = arith.extf %182 : vector<8x128xbf16> to vector<8x128xf32>
    %184 = arith.truncf %124 : vector<8x32xf32> to vector<8x32xbf16>
    %cst_48 = arith.constant dense<0.000000e+00> : vector<8x128xf32>
    %185 = tpu.matmul %184, %4, %cst_48 {dimension_numbers = #tpu.dot_dimension_numbers<[1], [0], [0], [1], [0, 0, 1, 1], [], []>} : vector<8x32xbf16>, vector<32x128xbf16>, vector<8x128xf32> -> vector<8x128xf32>
    %186 = arith.addf %183, %185 : vector<8x128xf32>
    %187 = vector.extract_strided_slice %186 {offsets = [0, 0], sizes = [8, 96], strides = [1, 1]} : vector<8x128xf32> to vector<8x96xf32>
    %188 = arith.negf %187 : vector<8x96xf32>
    %189 = math.exp %188 : vector<8x96xf32>
    %cst_49 = arith.constant 1.000000e+00 : f32
    %190 = vector.broadcast %cst_49 : f32 to vector<8x96xf32>
    %191 = arith.addf %190, %189 : vector<8x96xf32>
    %192 = arith.divf %190, %191 : vector<8x96xf32>
    %193 = vector.extract_strided_slice %186 {offsets = [0, 96], sizes = [8, 32], strides = [1, 1]} : vector<8x128xf32> to vector<8x32xf32>
    %194 = math.tanh %193 : vector<8x32xf32>
    %195 = vector.extract_strided_slice %192 {offsets = [0, 0], sizes = [8, 32], strides = [1, 1]} : vector<8x96xf32> to vector<8x32xf32>
    %196 = vector.extract_strided_slice %192 {offsets = [0, 32], sizes = [8, 32], strides = [1, 1]} : vector<8x96xf32> to vector<8x32xf32>
    %197 = vector.extract_strided_slice %192 {offsets = [0, 64], sizes = [8, 32], strides = [1, 1]} : vector<8x96xf32> to vector<8x32xf32>
    %198 = arith.mulf %196, %127 : vector<8x32xf32>
    %199 = arith.mulf %195, %194 : vector<8x32xf32>
    %200 = arith.addf %198, %199 : vector<8x32xf32>
    %201 = math.tanh %200 : vector<8x32xf32>
    %202 = arith.mulf %197, %201 : vector<8x32xf32>
    %203 = arith.addi %6, %c2_i32 : i32
    %204 = vector.broadcast %203 : i32 to vector<8x1xi32>
    %205 = arith.cmpi slt, %204, %3 : vector<8x1xi32>
    %206 = vector.shape_cast %205 : vector<8x1xi1> to vector<8x1xi1>
    %207 = vector.broadcast %206 : vector<8x1xi1> to vector<8x32xi1>
    %208 = arith.select %207, %202, %124 : vector<8x32xi1>, vector<8x32xf32>
    %209 = vector.shape_cast %205 : vector<8x1xi1> to vector<8x1xi1>
    %210 = vector.broadcast %209 : vector<8x1xi1> to vector<8x32xi1>
    %211 = arith.select %210, %200, %127 : vector<8x32xi1>, vector<8x32xf32>
    %cst_50 = arith.constant 0.000000e+00 : f32
    %212 = vector.shape_cast %205 : vector<8x1xi1> to vector<8x1xi1>
    %213 = vector.broadcast %212 : vector<8x1xi1> to vector<8x32xi1>
    %214 = vector.broadcast %cst_50 : f32 to vector<8x32xf32>
    %215 = arith.select %213, %202, %214 : vector<8x32xi1>, vector<8x32xf32>
    %216 = arith.truncf %215 : vector<8x32xf32> to vector<8x32xbf16>
    %217 = arith.index_cast %c2_i32 : i32 to index
    %c0_51 = arith.constant 0 : index
    %c0_52 = arith.constant 0 : index
    %218 = vector.load %arg6[%217, %c0_51, %c0_52] : memref<8x8x32xbf16, #tpu.memory_space<vmem>>, vector<1x8x32xbf16>
    %219 = vector.shape_cast %218 : vector<1x8x32xbf16> to vector<8x32xbf16>
    %220 = vector.shape_cast %216 : vector<8x32xbf16> to vector<1x8x32xbf16>
    tpu.vector_store %arg6[%217, %c0_51, %c0_52], %220 {strides = array<i32>} : memref<8x8x32xbf16, #tpu.memory_space<vmem>>, vector<1x8x32xbf16>,
    %c7_i32_53 = arith.constant 7 : i32
    %221 = arith.subi %c7_i32_53, %c2_i32 : i32
    %222 = arith.index_cast %221 : i32 to index
    %c0_54 = arith.constant 0 : index
    %c0_55 = arith.constant 0 : index
    %223 = vector.load %arg3[%222, %c0_54, %c0_55] : memref<8x8x128xbf16, #tpu.memory_space<vmem>>, vector<1x8x128xbf16>
    %224 = vector.shape_cast %223 : vector<1x8x128xbf16> to vector<8x128xbf16>
    %225 = arith.extf %224 : vector<8x128xbf16> to vector<8x128xf32>
    %226 = arith.truncf %166 : vector<8x32xf32> to vector<8x32xbf16>
    %cst_56 = arith.constant dense<0.000000e+00> : vector<8x128xf32>
    %227 = tpu.matmul %226, %5, %cst_56 {dimension_numbers = #tpu.dot_dimension_numbers<[1], [0], [0], [1], [0, 0, 1, 1], [], []>} : vector<8x32xbf16>, vector<32x128xbf16>, vector<8x128xf32> -> vector<8x128xf32>
    %228 = arith.addf %225, %227 : vector<8x128xf32>
    %229 = vector.extract_strided_slice %228 {offsets = [0, 0], sizes = [8, 96], strides = [1, 1]} : vector<8x128xf32> to vector<8x96xf32>
    %230 = arith.negf %229 : vector<8x96xf32>
    %231 = math.exp %230 : vector<8x96xf32>
    %cst_57 = arith.constant 1.000000e+00 : f32
    %232 = vector.broadcast %cst_57 : f32 to vector<8x96xf32>
    %233 = arith.addf %232, %231 : vector<8x96xf32>
    %234 = arith.divf %232, %233 : vector<8x96xf32>
    %235 = vector.extract_strided_slice %228 {offsets = [0, 96], sizes = [8, 32], strides = [1, 1]} : vector<8x128xf32> to vector<8x32xf32>
    %236 = math.tanh %235 : vector<8x32xf32>
    %237 = vector.extract_strided_slice %234 {offsets = [0, 0], sizes = [8, 32], strides = [1, 1]} : vector<8x96xf32> to vector<8x32xf32>
    %238 = vector.extract_strided_slice %234 {offsets = [0, 32], sizes = [8, 32], strides = [1, 1]} : vector<8x96xf32> to vector<8x32xf32>
    %239 = vector.extract_strided_slice %234 {offsets = [0, 64], sizes = [8, 32], strides = [1, 1]} : vector<8x96xf32> to vector<8x32xf32>
    %240 = arith.mulf %238, %169 : vector<8x32xf32>
    %241 = arith.mulf %237, %236 : vector<8x32xf32>
    %242 = arith.addf %240, %241 : vector<8x32xf32>
    %243 = math.tanh %242 : vector<8x32xf32>
    %244 = arith.mulf %239, %243 : vector<8x32xf32>
    %245 = arith.subi %7, %c2_i32 : i32
    %246 = vector.broadcast %245 : i32 to vector<8x1xi32>
    %247 = arith.cmpi slt, %246, %3 : vector<8x1xi32>
    %248 = vector.shape_cast %247 : vector<8x1xi1> to vector<8x1xi1>
    %249 = vector.broadcast %248 : vector<8x1xi1> to vector<8x32xi1>
    %250 = arith.select %249, %244, %166 : vector<8x32xi1>, vector<8x32xf32>
    %251 = vector.shape_cast %247 : vector<8x1xi1> to vector<8x1xi1>
    %252 = vector.broadcast %251 : vector<8x1xi1> to vector<8x32xi1>
    %253 = arith.select %252, %242, %169 : vector<8x32xi1>, vector<8x32xf32>
    %cst_58 = arith.constant 0.000000e+00 : f32
    %254 = vector.shape_cast %247 : vector<8x1xi1> to vector<8x1xi1>
    %255 = vector.broadcast %254 : vector<8x1xi1> to vector<8x32xi1>
    %256 = vector.broadcast %cst_58 : f32 to vector<8x32xf32>
    %257 = arith.select %255, %244, %256 : vector<8x32xi1>, vector<8x32xf32>
    %258 = arith.truncf %257 : vector<8x32xf32> to vector<8x32xbf16>
    %c7_i32_59 = arith.constant 7 : i32
    %259 = arith.subi %c7_i32_59, %c2_i32 : i32
    %260 = arith.index_cast %259 : i32 to index
    %c0_60 = arith.constant 0 : index
    %c0_61 = arith.constant 0 : index
    %261 = vector.load %arg7[%260, %c0_60, %c0_61] : memref<8x8x32xbf16, #tpu.memory_space<vmem>>, vector<1x8x32xbf16>
    %262 = vector.shape_cast %261 : vector<1x8x32xbf16> to vector<8x32xbf16>
    %263 = vector.shape_cast %258 : vector<8x32xbf16> to vector<1x8x32xbf16>
    tpu.vector_store %arg7[%260, %c0_60, %c0_61], %263 {strides = array<i32>} : memref<8x8x32xbf16, #tpu.memory_space<vmem>>, vector<1x8x32xbf16>,
    %c3_i32 = arith.constant 3 : i32
    %264 = arith.index_cast %c3_i32 : i32 to index
    %c0_62 = arith.constant 0 : index
    %c0_63 = arith.constant 0 : index
    %265 = vector.load %arg2[%264, %c0_62, %c0_63] : memref<8x8x128xbf16, #tpu.memory_space<vmem>>, vector<1x8x128xbf16>
    %266 = vector.shape_cast %265 : vector<1x8x128xbf16> to vector<8x128xbf16>
    %267 = arith.extf %266 : vector<8x128xbf16> to vector<8x128xf32>
    %268 = arith.truncf %208 : vector<8x32xf32> to vector<8x32xbf16>
    %cst_64 = arith.constant dense<0.000000e+00> : vector<8x128xf32>
    %269 = tpu.matmul %268, %4, %cst_64 {dimension_numbers = #tpu.dot_dimension_numbers<[1], [0], [0], [1], [0, 0, 1, 1], [], []>} : vector<8x32xbf16>, vector<32x128xbf16>, vector<8x128xf32> -> vector<8x128xf32>
    %270 = arith.addf %267, %269 : vector<8x128xf32>
    %271 = vector.extract_strided_slice %270 {offsets = [0, 0], sizes = [8, 96], strides = [1, 1]} : vector<8x128xf32> to vector<8x96xf32>
    %272 = arith.negf %271 : vector<8x96xf32>
    %273 = math.exp %272 : vector<8x96xf32>
    %cst_65 = arith.constant 1.000000e+00 : f32
    %274 = vector.broadcast %cst_65 : f32 to vector<8x96xf32>
    %275 = arith.addf %274, %273 : vector<8x96xf32>
    %276 = arith.divf %274, %275 : vector<8x96xf32>
    %277 = vector.extract_strided_slice %270 {offsets = [0, 96], sizes = [8, 32], strides = [1, 1]} : vector<8x128xf32> to vector<8x32xf32>
    %278 = math.tanh %277 : vector<8x32xf32>
    %279 = vector.extract_strided_slice %276 {offsets = [0, 0], sizes = [8, 32], strides = [1, 1]} : vector<8x96xf32> to vector<8x32xf32>
    %280 = vector.extract_strided_slice %276 {offsets = [0, 32], sizes = [8, 32], strides = [1, 1]} : vector<8x96xf32> to vector<8x32xf32>
    %281 = vector.extract_strided_slice %276 {offsets = [0, 64], sizes = [8, 32], strides = [1, 1]} : vector<8x96xf32> to vector<8x32xf32>
    %282 = arith.mulf %280, %211 : vector<8x32xf32>
    %283 = arith.mulf %279, %278 : vector<8x32xf32>
    %284 = arith.addf %282, %283 : vector<8x32xf32>
    %285 = math.tanh %284 : vector<8x32xf32>
    %286 = arith.mulf %281, %285 : vector<8x32xf32>
    %287 = arith.addi %6, %c3_i32 : i32
    %288 = vector.broadcast %287 : i32 to vector<8x1xi32>
    %289 = arith.cmpi slt, %288, %3 : vector<8x1xi32>
    %290 = vector.shape_cast %289 : vector<8x1xi1> to vector<8x1xi1>
    %291 = vector.broadcast %290 : vector<8x1xi1> to vector<8x32xi1>
    %292 = arith.select %291, %286, %208 : vector<8x32xi1>, vector<8x32xf32>
    %293 = vector.shape_cast %289 : vector<8x1xi1> to vector<8x1xi1>
    %294 = vector.broadcast %293 : vector<8x1xi1> to vector<8x32xi1>
    %295 = arith.select %294, %284, %211 : vector<8x32xi1>, vector<8x32xf32>
    %cst_66 = arith.constant 0.000000e+00 : f32
    %296 = vector.shape_cast %289 : vector<8x1xi1> to vector<8x1xi1>
    %297 = vector.broadcast %296 : vector<8x1xi1> to vector<8x32xi1>
    %298 = vector.broadcast %cst_66 : f32 to vector<8x32xf32>
    %299 = arith.select %297, %286, %298 : vector<8x32xi1>, vector<8x32xf32>
    %300 = arith.truncf %299 : vector<8x32xf32> to vector<8x32xbf16>
    %301 = arith.index_cast %c3_i32 : i32 to index
    %c0_67 = arith.constant 0 : index
    %c0_68 = arith.constant 0 : index
    %302 = vector.load %arg6[%301, %c0_67, %c0_68] : memref<8x8x32xbf16, #tpu.memory_space<vmem>>, vector<1x8x32xbf16>
    %303 = vector.shape_cast %302 : vector<1x8x32xbf16> to vector<8x32xbf16>
    %304 = vector.shape_cast %300 : vector<8x32xbf16> to vector<1x8x32xbf16>
    tpu.vector_store %arg6[%301, %c0_67, %c0_68], %304 {strides = array<i32>} : memref<8x8x32xbf16, #tpu.memory_space<vmem>>, vector<1x8x32xbf16>,
    %c7_i32_69 = arith.constant 7 : i32
    %305 = arith.subi %c7_i32_69, %c3_i32 : i32
    %306 = arith.index_cast %305 : i32 to index
    %c0_70 = arith.constant 0 : index
    %c0_71 = arith.constant 0 : index
    %307 = vector.load %arg3[%306, %c0_70, %c0_71] : memref<8x8x128xbf16, #tpu.memory_space<vmem>>, vector<1x8x128xbf16>
    %308 = vector.shape_cast %307 : vector<1x8x128xbf16> to vector<8x128xbf16>
    %309 = arith.extf %308 : vector<8x128xbf16> to vector<8x128xf32>
    %310 = arith.truncf %250 : vector<8x32xf32> to vector<8x32xbf16>
    %cst_72 = arith.constant dense<0.000000e+00> : vector<8x128xf32>
    %311 = tpu.matmul %310, %5, %cst_72 {dimension_numbers = #tpu.dot_dimension_numbers<[1], [0], [0], [1], [0, 0, 1, 1], [], []>} : vector<8x32xbf16>, vector<32x128xbf16>, vector<8x128xf32> -> vector<8x128xf32>
    %312 = arith.addf %309, %311 : vector<8x128xf32>
    %313 = vector.extract_strided_slice %312 {offsets = [0, 0], sizes = [8, 96], strides = [1, 1]} : vector<8x128xf32> to vector<8x96xf32>
    %314 = arith.negf %313 : vector<8x96xf32>
    %315 = math.exp %314 : vector<8x96xf32>
    %cst_73 = arith.constant 1.000000e+00 : f32
    %316 = vector.broadcast %cst_73 : f32 to vector<8x96xf32>
    %317 = arith.addf %316, %315 : vector<8x96xf32>
    %318 = arith.divf %316, %317 : vector<8x96xf32>
    %319 = vector.extract_strided_slice %312 {offsets = [0, 96], sizes = [8, 32], strides = [1, 1]} : vector<8x128xf32> to vector<8x32xf32>
    %320 = math.tanh %319 : vector<8x32xf32>
    %321 = vector.extract_strided_slice %318 {offsets = [0, 0], sizes = [8, 32], strides = [1, 1]} : vector<8x96xf32> to vector<8x32xf32>
    %322 = vector.extract_strided_slice %318 {offsets = [0, 32], sizes = [8, 32], strides = [1, 1]} : vector<8x96xf32> to vector<8x32xf32>
    %323 = vector.extract_strided_slice %318 {offsets = [0, 64], sizes = [8, 32], strides = [1, 1]} : vector<8x96xf32> to vector<8x32xf32>
    %324 = arith.mulf %322, %253 : vector<8x32xf32>
    %325 = arith.mulf %321, %320 : vector<8x32xf32>
    %326 = arith.addf %324, %325 : vector<8x32xf32>
    %327 = math.tanh %326 : vector<8x32xf32>
    %328 = arith.mulf %323, %327 : vector<8x32xf32>
    %329 = arith.subi %7, %c3_i32 : i32
    %330 = vector.broadcast %329 : i32 to vector<8x1xi32>
    %331 = arith.cmpi slt, %330, %3 : vector<8x1xi32>
    %332 = vector.shape_cast %331 : vector<8x1xi1> to vector<8x1xi1>
    %333 = vector.broadcast %332 : vector<8x1xi1> to vector<8x32xi1>
    %334 = arith.select %333, %328, %250 : vector<8x32xi1>, vector<8x32xf32>
    %335 = vector.shape_cast %331 : vector<8x1xi1> to vector<8x1xi1>
    %336 = vector.broadcast %335 : vector<8x1xi1> to vector<8x32xi1>
    %337 = arith.select %336, %326, %253 : vector<8x32xi1>, vector<8x32xf32>
    %cst_74 = arith.constant 0.000000e+00 : f32
    %338 = vector.shape_cast %331 : vector<8x1xi1> to vector<8x1xi1>
    %339 = vector.broadcast %338 : vector<8x1xi1> to vector<8x32xi1>
    %340 = vector.broadcast %cst_74 : f32 to vector<8x32xf32>
    %341 = arith.select %339, %328, %340 : vector<8x32xi1>, vector<8x32xf32>
    %342 = arith.truncf %341 : vector<8x32xf32> to vector<8x32xbf16>
    %c7_i32_75 = arith.constant 7 : i32
    %343 = arith.subi %c7_i32_75, %c3_i32 : i32
    %344 = arith.index_cast %343 : i32 to index
    %c0_76 = arith.constant 0 : index
    %c0_77 = arith.constant 0 : index
    %345 = vector.load %arg7[%344, %c0_76, %c0_77] : memref<8x8x32xbf16, #tpu.memory_space<vmem>>, vector<1x8x32xbf16>
    %346 = vector.shape_cast %345 : vector<1x8x32xbf16> to vector<8x32xbf16>
    %347 = vector.shape_cast %342 : vector<8x32xbf16> to vector<1x8x32xbf16>
    tpu.vector_store %arg7[%344, %c0_76, %c0_77], %347 {strides = array<i32>} : memref<8x8x32xbf16, #tpu.memory_space<vmem>>, vector<1x8x32xbf16>,
    %c4_i32 = arith.constant 4 : i32
    %348 = arith.index_cast %c4_i32 : i32 to index
    %c0_78 = arith.constant 0 : index
    %c0_79 = arith.constant 0 : index
    %349 = vector.load %arg2[%348, %c0_78, %c0_79] : memref<8x8x128xbf16, #tpu.memory_space<vmem>>, vector<1x8x128xbf16>
    %350 = vector.shape_cast %349 : vector<1x8x128xbf16> to vector<8x128xbf16>
    %351 = arith.extf %350 : vector<8x128xbf16> to vector<8x128xf32>
    %352 = arith.truncf %292 : vector<8x32xf32> to vector<8x32xbf16>
    %cst_80 = arith.constant dense<0.000000e+00> : vector<8x128xf32>
    %353 = tpu.matmul %352, %4, %cst_80 {dimension_numbers = #tpu.dot_dimension_numbers<[1], [0], [0], [1], [0, 0, 1, 1], [], []>} : vector<8x32xbf16>, vector<32x128xbf16>, vector<8x128xf32> -> vector<8x128xf32>
    %354 = arith.addf %351, %353 : vector<8x128xf32>
    %355 = vector.extract_strided_slice %354 {offsets = [0, 0], sizes = [8, 96], strides = [1, 1]} : vector<8x128xf32> to vector<8x96xf32>
    %356 = arith.negf %355 : vector<8x96xf32>
    %357 = math.exp %356 : vector<8x96xf32>
    %cst_81 = arith.constant 1.000000e+00 : f32
    %358 = vector.broadcast %cst_81 : f32 to vector<8x96xf32>
    %359 = arith.addf %358, %357 : vector<8x96xf32>
    %360 = arith.divf %358, %359 : vector<8x96xf32>
    %361 = vector.extract_strided_slice %354 {offsets = [0, 96], sizes = [8, 32], strides = [1, 1]} : vector<8x128xf32> to vector<8x32xf32>
    %362 = math.tanh %361 : vector<8x32xf32>
    %363 = vector.extract_strided_slice %360 {offsets = [0, 0], sizes = [8, 32], strides = [1, 1]} : vector<8x96xf32> to vector<8x32xf32>
    %364 = vector.extract_strided_slice %360 {offsets = [0, 32], sizes = [8, 32], strides = [1, 1]} : vector<8x96xf32> to vector<8x32xf32>
    %365 = vector.extract_strided_slice %360 {offsets = [0, 64], sizes = [8, 32], strides = [1, 1]} : vector<8x96xf32> to vector<8x32xf32>
    %366 = arith.mulf %364, %295 : vector<8x32xf32>
    %367 = arith.mulf %363, %362 : vector<8x32xf32>
    %368 = arith.addf %366, %367 : vector<8x32xf32>
    %369 = math.tanh %368 : vector<8x32xf32>
    %370 = arith.mulf %365, %369 : vector<8x32xf32>
    %371 = arith.addi %6, %c4_i32 : i32
    %372 = vector.broadcast %371 : i32 to vector<8x1xi32>
    %373 = arith.cmpi slt, %372, %3 : vector<8x1xi32>
    %374 = vector.shape_cast %373 : vector<8x1xi1> to vector<8x1xi1>
    %375 = vector.broadcast %374 : vector<8x1xi1> to vector<8x32xi1>
    %376 = arith.select %375, %370, %292 : vector<8x32xi1>, vector<8x32xf32>
    %377 = vector.shape_cast %373 : vector<8x1xi1> to vector<8x1xi1>
    %378 = vector.broadcast %377 : vector<8x1xi1> to vector<8x32xi1>
    %379 = arith.select %378, %368, %295 : vector<8x32xi1>, vector<8x32xf32>
    %cst_82 = arith.constant 0.000000e+00 : f32
    %380 = vector.shape_cast %373 : vector<8x1xi1> to vector<8x1xi1>
    %381 = vector.broadcast %380 : vector<8x1xi1> to vector<8x32xi1>
    %382 = vector.broadcast %cst_82 : f32 to vector<8x32xf32>
    %383 = arith.select %381, %370, %382 : vector<8x32xi1>, vector<8x32xf32>
    %384 = arith.truncf %383 : vector<8x32xf32> to vector<8x32xbf16>
    %385 = arith.index_cast %c4_i32 : i32 to index
    %c0_83 = arith.constant 0 : index
    %c0_84 = arith.constant 0 : index
    %386 = vector.load %arg6[%385, %c0_83, %c0_84] : memref<8x8x32xbf16, #tpu.memory_space<vmem>>, vector<1x8x32xbf16>
    %387 = vector.shape_cast %386 : vector<1x8x32xbf16> to vector<8x32xbf16>
    %388 = vector.shape_cast %384 : vector<8x32xbf16> to vector<1x8x32xbf16>
    tpu.vector_store %arg6[%385, %c0_83, %c0_84], %388 {strides = array<i32>} : memref<8x8x32xbf16, #tpu.memory_space<vmem>>, vector<1x8x32xbf16>,
    %c7_i32_85 = arith.constant 7 : i32
    %389 = arith.subi %c7_i32_85, %c4_i32 : i32
    %390 = arith.index_cast %389 : i32 to index
    %c0_86 = arith.constant 0 : index
    %c0_87 = arith.constant 0 : index
    %391 = vector.load %arg3[%390, %c0_86, %c0_87] : memref<8x8x128xbf16, #tpu.memory_space<vmem>>, vector<1x8x128xbf16>
    %392 = vector.shape_cast %391 : vector<1x8x128xbf16> to vector<8x128xbf16>
    %393 = arith.extf %392 : vector<8x128xbf16> to vector<8x128xf32>
    %394 = arith.truncf %334 : vector<8x32xf32> to vector<8x32xbf16>
    %cst_88 = arith.constant dense<0.000000e+00> : vector<8x128xf32>
    %395 = tpu.matmul %394, %5, %cst_88 {dimension_numbers = #tpu.dot_dimension_numbers<[1], [0], [0], [1], [0, 0, 1, 1], [], []>} : vector<8x32xbf16>, vector<32x128xbf16>, vector<8x128xf32> -> vector<8x128xf32>
    %396 = arith.addf %393, %395 : vector<8x128xf32>
    %397 = vector.extract_strided_slice %396 {offsets = [0, 0], sizes = [8, 96], strides = [1, 1]} : vector<8x128xf32> to vector<8x96xf32>
    %398 = arith.negf %397 : vector<8x96xf32>
    %399 = math.exp %398 : vector<8x96xf32>
    %cst_89 = arith.constant 1.000000e+00 : f32
    %400 = vector.broadcast %cst_89 : f32 to vector<8x96xf32>
    %401 = arith.addf %400, %399 : vector<8x96xf32>
    %402 = arith.divf %400, %401 : vector<8x96xf32>
    %403 = vector.extract_strided_slice %396 {offsets = [0, 96], sizes = [8, 32], strides = [1, 1]} : vector<8x128xf32> to vector<8x32xf32>
    %404 = math.tanh %403 : vector<8x32xf32>
    %405 = vector.extract_strided_slice %402 {offsets = [0, 0], sizes = [8, 32], strides = [1, 1]} : vector<8x96xf32> to vector<8x32xf32>
    %406 = vector.extract_strided_slice %402 {offsets = [0, 32], sizes = [8, 32], strides = [1, 1]} : vector<8x96xf32> to vector<8x32xf32>
    %407 = vector.extract_strided_slice %402 {offsets = [0, 64], sizes = [8, 32], strides = [1, 1]} : vector<8x96xf32> to vector<8x32xf32>
    %408 = arith.mulf %406, %337 : vector<8x32xf32>
    %409 = arith.mulf %405, %404 : vector<8x32xf32>
    %410 = arith.addf %408, %409 : vector<8x32xf32>
    %411 = math.tanh %410 : vector<8x32xf32>
    %412 = arith.mulf %407, %411 : vector<8x32xf32>
    %413 = arith.subi %7, %c4_i32 : i32
    %414 = vector.broadcast %413 : i32 to vector<8x1xi32>
    %415 = arith.cmpi slt, %414, %3 : vector<8x1xi32>
    %416 = vector.shape_cast %415 : vector<8x1xi1> to vector<8x1xi1>
    %417 = vector.broadcast %416 : vector<8x1xi1> to vector<8x32xi1>
    %418 = arith.select %417, %412, %334 : vector<8x32xi1>, vector<8x32xf32>
    %419 = vector.shape_cast %415 : vector<8x1xi1> to vector<8x1xi1>
    %420 = vector.broadcast %419 : vector<8x1xi1> to vector<8x32xi1>
    %421 = arith.select %420, %410, %337 : vector<8x32xi1>, vector<8x32xf32>
    %cst_90 = arith.constant 0.000000e+00 : f32
    %422 = vector.shape_cast %415 : vector<8x1xi1> to vector<8x1xi1>
    %423 = vector.broadcast %422 : vector<8x1xi1> to vector<8x32xi1>
    %424 = vector.broadcast %cst_90 : f32 to vector<8x32xf32>
    %425 = arith.select %423, %412, %424 : vector<8x32xi1>, vector<8x32xf32>
    %426 = arith.truncf %425 : vector<8x32xf32> to vector<8x32xbf16>
    %c7_i32_91 = arith.constant 7 : i32
    %427 = arith.subi %c7_i32_91, %c4_i32 : i32
    %428 = arith.index_cast %427 : i32 to index
    %c0_92 = arith.constant 0 : index
    %c0_93 = arith.constant 0 : index
    %429 = vector.load %arg7[%428, %c0_92, %c0_93] : memref<8x8x32xbf16, #tpu.memory_space<vmem>>, vector<1x8x32xbf16>
    %430 = vector.shape_cast %429 : vector<1x8x32xbf16> to vector<8x32xbf16>
    %431 = vector.shape_cast %426 : vector<8x32xbf16> to vector<1x8x32xbf16>
    tpu.vector_store %arg7[%428, %c0_92, %c0_93], %431 {strides = array<i32>} : memref<8x8x32xbf16, #tpu.memory_space<vmem>>, vector<1x8x32xbf16>,
    %c5_i32 = arith.constant 5 : i32
    %432 = arith.index_cast %c5_i32 : i32 to index
    %c0_94 = arith.constant 0 : index
    %c0_95 = arith.constant 0 : index
    %433 = vector.load %arg2[%432, %c0_94, %c0_95] : memref<8x8x128xbf16, #tpu.memory_space<vmem>>, vector<1x8x128xbf16>
    %434 = vector.shape_cast %433 : vector<1x8x128xbf16> to vector<8x128xbf16>
    %435 = arith.extf %434 : vector<8x128xbf16> to vector<8x128xf32>
    %436 = arith.truncf %376 : vector<8x32xf32> to vector<8x32xbf16>
    %cst_96 = arith.constant dense<0.000000e+00> : vector<8x128xf32>
    %437 = tpu.matmul %436, %4, %cst_96 {dimension_numbers = #tpu.dot_dimension_numbers<[1], [0], [0], [1], [0, 0, 1, 1], [], []>} : vector<8x32xbf16>, vector<32x128xbf16>, vector<8x128xf32> -> vector<8x128xf32>
    %438 = arith.addf %435, %437 : vector<8x128xf32>
    %439 = vector.extract_strided_slice %438 {offsets = [0, 0], sizes = [8, 96], strides = [1, 1]} : vector<8x128xf32> to vector<8x96xf32>
    %440 = arith.negf %439 : vector<8x96xf32>
    %441 = math.exp %440 : vector<8x96xf32>
    %cst_97 = arith.constant 1.000000e+00 : f32
    %442 = vector.broadcast %cst_97 : f32 to vector<8x96xf32>
    %443 = arith.addf %442, %441 : vector<8x96xf32>
    %444 = arith.divf %442, %443 : vector<8x96xf32>
    %445 = vector.extract_strided_slice %438 {offsets = [0, 96], sizes = [8, 32], strides = [1, 1]} : vector<8x128xf32> to vector<8x32xf32>
    %446 = math.tanh %445 : vector<8x32xf32>
    %447 = vector.extract_strided_slice %444 {offsets = [0, 0], sizes = [8, 32], strides = [1, 1]} : vector<8x96xf32> to vector<8x32xf32>
    %448 = vector.extract_strided_slice %444 {offsets = [0, 32], sizes = [8, 32], strides = [1, 1]} : vector<8x96xf32> to vector<8x32xf32>
    %449 = vector.extract_strided_slice %444 {offsets = [0, 64], sizes = [8, 32], strides = [1, 1]} : vector<8x96xf32> to vector<8x32xf32>
    %450 = arith.mulf %448, %379 : vector<8x32xf32>
    %451 = arith.mulf %447, %446 : vector<8x32xf32>
    %452 = arith.addf %450, %451 : vector<8x32xf32>
    %453 = math.tanh %452 : vector<8x32xf32>
    %454 = arith.mulf %449, %453 : vector<8x32xf32>
    %455 = arith.addi %6, %c5_i32 : i32
    %456 = vector.broadcast %455 : i32 to vector<8x1xi32>
    %457 = arith.cmpi slt, %456, %3 : vector<8x1xi32>
    %458 = vector.shape_cast %457 : vector<8x1xi1> to vector<8x1xi1>
    %459 = vector.broadcast %458 : vector<8x1xi1> to vector<8x32xi1>
    %460 = arith.select %459, %454, %376 : vector<8x32xi1>, vector<8x32xf32>
    %461 = vector.shape_cast %457 : vector<8x1xi1> to vector<8x1xi1>
    %462 = vector.broadcast %461 : vector<8x1xi1> to vector<8x32xi1>
    %463 = arith.select %462, %452, %379 : vector<8x32xi1>, vector<8x32xf32>
    %cst_98 = arith.constant 0.000000e+00 : f32
    %464 = vector.shape_cast %457 : vector<8x1xi1> to vector<8x1xi1>
    %465 = vector.broadcast %464 : vector<8x1xi1> to vector<8x32xi1>
    %466 = vector.broadcast %cst_98 : f32 to vector<8x32xf32>
    %467 = arith.select %465, %454, %466 : vector<8x32xi1>, vector<8x32xf32>
    %468 = arith.truncf %467 : vector<8x32xf32> to vector<8x32xbf16>
    %469 = arith.index_cast %c5_i32 : i32 to index
    %c0_99 = arith.constant 0 : index
    %c0_100 = arith.constant 0 : index
    %470 = vector.load %arg6[%469, %c0_99, %c0_100] : memref<8x8x32xbf16, #tpu.memory_space<vmem>>, vector<1x8x32xbf16>
    %471 = vector.shape_cast %470 : vector<1x8x32xbf16> to vector<8x32xbf16>
    %472 = vector.shape_cast %468 : vector<8x32xbf16> to vector<1x8x32xbf16>
    tpu.vector_store %arg6[%469, %c0_99, %c0_100], %472 {strides = array<i32>} : memref<8x8x32xbf16, #tpu.memory_space<vmem>>, vector<1x8x32xbf16>,
    %c7_i32_101 = arith.constant 7 : i32
    %473 = arith.subi %c7_i32_101, %c5_i32 : i32
    %474 = arith.index_cast %473 : i32 to index
    %c0_102 = arith.constant 0 : index
    %c0_103 = arith.constant 0 : index
    %475 = vector.load %arg3[%474, %c0_102, %c0_103] : memref<8x8x128xbf16, #tpu.memory_space<vmem>>, vector<1x8x128xbf16>
    %476 = vector.shape_cast %475 : vector<1x8x128xbf16> to vector<8x128xbf16>
    %477 = arith.extf %476 : vector<8x128xbf16> to vector<8x128xf32>
    %478 = arith.truncf %418 : vector<8x32xf32> to vector<8x32xbf16>
    %cst_104 = arith.constant dense<0.000000e+00> : vector<8x128xf32>
    %479 = tpu.matmul %478, %5, %cst_104 {dimension_numbers = #tpu.dot_dimension_numbers<[1], [0], [0], [1], [0, 0, 1, 1], [], []>} : vector<8x32xbf16>, vector<32x128xbf16>, vector<8x128xf32> -> vector<8x128xf32>
    %480 = arith.addf %477, %479 : vector<8x128xf32>
    %481 = vector.extract_strided_slice %480 {offsets = [0, 0], sizes = [8, 96], strides = [1, 1]} : vector<8x128xf32> to vector<8x96xf32>
    %482 = arith.negf %481 : vector<8x96xf32>
    %483 = math.exp %482 : vector<8x96xf32>
    %cst_105 = arith.constant 1.000000e+00 : f32
    %484 = vector.broadcast %cst_105 : f32 to vector<8x96xf32>
    %485 = arith.addf %484, %483 : vector<8x96xf32>
    %486 = arith.divf %484, %485 : vector<8x96xf32>
    %487 = vector.extract_strided_slice %480 {offsets = [0, 96], sizes = [8, 32], strides = [1, 1]} : vector<8x128xf32> to vector<8x32xf32>
    %488 = math.tanh %487 : vector<8x32xf32>
    %489 = vector.extract_strided_slice %486 {offsets = [0, 0], sizes = [8, 32], strides = [1, 1]} : vector<8x96xf32> to vector<8x32xf32>
    %490 = vector.extract_strided_slice %486 {offsets = [0, 32], sizes = [8, 32], strides = [1, 1]} : vector<8x96xf32> to vector<8x32xf32>
    %491 = vector.extract_strided_slice %486 {offsets = [0, 64], sizes = [8, 32], strides = [1, 1]} : vector<8x96xf32> to vector<8x32xf32>
    %492 = arith.mulf %490, %421 : vector<8x32xf32>
    %493 = arith.mulf %489, %488 : vector<8x32xf32>
    %494 = arith.addf %492, %493 : vector<8x32xf32>
    %495 = math.tanh %494 : vector<8x32xf32>
    %496 = arith.mulf %491, %495 : vector<8x32xf32>
    %497 = arith.subi %7, %c5_i32 : i32
    %498 = vector.broadcast %497 : i32 to vector<8x1xi32>
    %499 = arith.cmpi slt, %498, %3 : vector<8x1xi32>
    %500 = vector.shape_cast %499 : vector<8x1xi1> to vector<8x1xi1>
    %501 = vector.broadcast %500 : vector<8x1xi1> to vector<8x32xi1>
    %502 = arith.select %501, %496, %418 : vector<8x32xi1>, vector<8x32xf32>
    %503 = vector.shape_cast %499 : vector<8x1xi1> to vector<8x1xi1>
    %504 = vector.broadcast %503 : vector<8x1xi1> to vector<8x32xi1>
    %505 = arith.select %504, %494, %421 : vector<8x32xi1>, vector<8x32xf32>
    %cst_106 = arith.constant 0.000000e+00 : f32
    %506 = vector.shape_cast %499 : vector<8x1xi1> to vector<8x1xi1>
    %507 = vector.broadcast %506 : vector<8x1xi1> to vector<8x32xi1>
    %508 = vector.broadcast %cst_106 : f32 to vector<8x32xf32>
    %509 = arith.select %507, %496, %508 : vector<8x32xi1>, vector<8x32xf32>
    %510 = arith.truncf %509 : vector<8x32xf32> to vector<8x32xbf16>
    %c7_i32_107 = arith.constant 7 : i32
    %511 = arith.subi %c7_i32_107, %c5_i32 : i32
    %512 = arith.index_cast %511 : i32 to index
    %c0_108 = arith.constant 0 : index
    %c0_109 = arith.constant 0 : index
    %513 = vector.load %arg7[%512, %c0_108, %c0_109] : memref<8x8x32xbf16, #tpu.memory_space<vmem>>, vector<1x8x32xbf16>
    %514 = vector.shape_cast %513 : vector<1x8x32xbf16> to vector<8x32xbf16>
    %515 = vector.shape_cast %510 : vector<8x32xbf16> to vector<1x8x32xbf16>
    tpu.vector_store %arg7[%512, %c0_108, %c0_109], %515 {strides = array<i32>} : memref<8x8x32xbf16, #tpu.memory_space<vmem>>, vector<1x8x32xbf16>,
    %c6_i32 = arith.constant 6 : i32
    %516 = arith.index_cast %c6_i32 : i32 to index
    %c0_110 = arith.constant 0 : index
    %c0_111 = arith.constant 0 : index
    %517 = vector.load %arg2[%516, %c0_110, %c0_111] : memref<8x8x128xbf16, #tpu.memory_space<vmem>>, vector<1x8x128xbf16>
    %518 = vector.shape_cast %517 : vector<1x8x128xbf16> to vector<8x128xbf16>
    %519 = arith.extf %518 : vector<8x128xbf16> to vector<8x128xf32>
    %520 = arith.truncf %460 : vector<8x32xf32> to vector<8x32xbf16>
    %cst_112 = arith.constant dense<0.000000e+00> : vector<8x128xf32>
    %521 = tpu.matmul %520, %4, %cst_112 {dimension_numbers = #tpu.dot_dimension_numbers<[1], [0], [0], [1], [0, 0, 1, 1], [], []>} : vector<8x32xbf16>, vector<32x128xbf16>, vector<8x128xf32> -> vector<8x128xf32>
    %522 = arith.addf %519, %521 : vector<8x128xf32>
    %523 = vector.extract_strided_slice %522 {offsets = [0, 0], sizes = [8, 96], strides = [1, 1]} : vector<8x128xf32> to vector<8x96xf32>
    %524 = arith.negf %523 : vector<8x96xf32>
    %525 = math.exp %524 : vector<8x96xf32>
    %cst_113 = arith.constant 1.000000e+00 : f32
    %526 = vector.broadcast %cst_113 : f32 to vector<8x96xf32>
    %527 = arith.addf %526, %525 : vector<8x96xf32>
    %528 = arith.divf %526, %527 : vector<8x96xf32>
    %529 = vector.extract_strided_slice %522 {offsets = [0, 96], sizes = [8, 32], strides = [1, 1]} : vector<8x128xf32> to vector<8x32xf32>
    %530 = math.tanh %529 : vector<8x32xf32>
    %531 = vector.extract_strided_slice %528 {offsets = [0, 0], sizes = [8, 32], strides = [1, 1]} : vector<8x96xf32> to vector<8x32xf32>
    %532 = vector.extract_strided_slice %528 {offsets = [0, 32], sizes = [8, 32], strides = [1, 1]} : vector<8x96xf32> to vector<8x32xf32>
    %533 = vector.extract_strided_slice %528 {offsets = [0, 64], sizes = [8, 32], strides = [1, 1]} : vector<8x96xf32> to vector<8x32xf32>
    %534 = arith.mulf %532, %463 : vector<8x32xf32>
    %535 = arith.mulf %531, %530 : vector<8x32xf32>
    %536 = arith.addf %534, %535 : vector<8x32xf32>
    %537 = math.tanh %536 : vector<8x32xf32>
    %538 = arith.mulf %533, %537 : vector<8x32xf32>
    %539 = arith.addi %6, %c6_i32 : i32
    %540 = vector.broadcast %539 : i32 to vector<8x1xi32>
    %541 = arith.cmpi slt, %540, %3 : vector<8x1xi32>
    %542 = vector.shape_cast %541 : vector<8x1xi1> to vector<8x1xi1>
    %543 = vector.broadcast %542 : vector<8x1xi1> to vector<8x32xi1>
    %544 = arith.select %543, %538, %460 : vector<8x32xi1>, vector<8x32xf32>
    %545 = vector.shape_cast %541 : vector<8x1xi1> to vector<8x1xi1>
    %546 = vector.broadcast %545 : vector<8x1xi1> to vector<8x32xi1>
    %547 = arith.select %546, %536, %463 : vector<8x32xi1>, vector<8x32xf32>
    %cst_114 = arith.constant 0.000000e+00 : f32
    %548 = vector.shape_cast %541 : vector<8x1xi1> to vector<8x1xi1>
    %549 = vector.broadcast %548 : vector<8x1xi1> to vector<8x32xi1>
    %550 = vector.broadcast %cst_114 : f32 to vector<8x32xf32>
    %551 = arith.select %549, %538, %550 : vector<8x32xi1>, vector<8x32xf32>
    %552 = arith.truncf %551 : vector<8x32xf32> to vector<8x32xbf16>
    %553 = arith.index_cast %c6_i32 : i32 to index
    %c0_115 = arith.constant 0 : index
    %c0_116 = arith.constant 0 : index
    %554 = vector.load %arg6[%553, %c0_115, %c0_116] : memref<8x8x32xbf16, #tpu.memory_space<vmem>>, vector<1x8x32xbf16>
    %555 = vector.shape_cast %554 : vector<1x8x32xbf16> to vector<8x32xbf16>
    %556 = vector.shape_cast %552 : vector<8x32xbf16> to vector<1x8x32xbf16>
    tpu.vector_store %arg6[%553, %c0_115, %c0_116], %556 {strides = array<i32>} : memref<8x8x32xbf16, #tpu.memory_space<vmem>>, vector<1x8x32xbf16>,
    %c7_i32_117 = arith.constant 7 : i32
    %557 = arith.subi %c7_i32_117, %c6_i32 : i32
    %558 = arith.index_cast %557 : i32 to index
    %c0_118 = arith.constant 0 : index
    %c0_119 = arith.constant 0 : index
    %559 = vector.load %arg3[%558, %c0_118, %c0_119] : memref<8x8x128xbf16, #tpu.memory_space<vmem>>, vector<1x8x128xbf16>
    %560 = vector.shape_cast %559 : vector<1x8x128xbf16> to vector<8x128xbf16>
    %561 = arith.extf %560 : vector<8x128xbf16> to vector<8x128xf32>
    %562 = arith.truncf %502 : vector<8x32xf32> to vector<8x32xbf16>
    %cst_120 = arith.constant dense<0.000000e+00> : vector<8x128xf32>
    %563 = tpu.matmul %562, %5, %cst_120 {dimension_numbers = #tpu.dot_dimension_numbers<[1], [0], [0], [1], [0, 0, 1, 1], [], []>} : vector<8x32xbf16>, vector<32x128xbf16>, vector<8x128xf32> -> vector<8x128xf32>
    %564 = arith.addf %561, %563 : vector<8x128xf32>
    %565 = vector.extract_strided_slice %564 {offsets = [0, 0], sizes = [8, 96], strides = [1, 1]} : vector<8x128xf32> to vector<8x96xf32>
    %566 = arith.negf %565 : vector<8x96xf32>
    %567 = math.exp %566 : vector<8x96xf32>
    %cst_121 = arith.constant 1.000000e+00 : f32
    %568 = vector.broadcast %cst_121 : f32 to vector<8x96xf32>
    %569 = arith.addf %568, %567 : vector<8x96xf32>
    %570 = arith.divf %568, %569 : vector<8x96xf32>
    %571 = vector.extract_strided_slice %564 {offsets = [0, 96], sizes = [8, 32], strides = [1, 1]} : vector<8x128xf32> to vector<8x32xf32>
    %572 = math.tanh %571 : vector<8x32xf32>
    %573 = vector.extract_strided_slice %570 {offsets = [0, 0], sizes = [8, 32], strides = [1, 1]} : vector<8x96xf32> to vector<8x32xf32>
    %574 = vector.extract_strided_slice %570 {offsets = [0, 32], sizes = [8, 32], strides = [1, 1]} : vector<8x96xf32> to vector<8x32xf32>
    %575 = vector.extract_strided_slice %570 {offsets = [0, 64], sizes = [8, 32], strides = [1, 1]} : vector<8x96xf32> to vector<8x32xf32>
    %576 = arith.mulf %574, %505 : vector<8x32xf32>
    %577 = arith.mulf %573, %572 : vector<8x32xf32>
    %578 = arith.addf %576, %577 : vector<8x32xf32>
    %579 = math.tanh %578 : vector<8x32xf32>
    %580 = arith.mulf %575, %579 : vector<8x32xf32>
    %581 = arith.subi %7, %c6_i32 : i32
    %582 = vector.broadcast %581 : i32 to vector<8x1xi32>
    %583 = arith.cmpi slt, %582, %3 : vector<8x1xi32>
    %584 = vector.shape_cast %583 : vector<8x1xi1> to vector<8x1xi1>
    %585 = vector.broadcast %584 : vector<8x1xi1> to vector<8x32xi1>
    %586 = arith.select %585, %580, %502 : vector<8x32xi1>, vector<8x32xf32>
    %587 = vector.shape_cast %583 : vector<8x1xi1> to vector<8x1xi1>
    %588 = vector.broadcast %587 : vector<8x1xi1> to vector<8x32xi1>
    %589 = arith.select %588, %578, %505 : vector<8x32xi1>, vector<8x32xf32>
    %cst_122 = arith.constant 0.000000e+00 : f32
    %590 = vector.shape_cast %583 : vector<8x1xi1> to vector<8x1xi1>
    %591 = vector.broadcast %590 : vector<8x1xi1> to vector<8x32xi1>
    %592 = vector.broadcast %cst_122 : f32 to vector<8x32xf32>
    %593 = arith.select %591, %580, %592 : vector<8x32xi1>, vector<8x32xf32>
    %594 = arith.truncf %593 : vector<8x32xf32> to vector<8x32xbf16>
    %c7_i32_123 = arith.constant 7 : i32
    %595 = arith.subi %c7_i32_123, %c6_i32 : i32
    %596 = arith.index_cast %595 : i32 to index
    %c0_124 = arith.constant 0 : index
    %c0_125 = arith.constant 0 : index
    %597 = vector.load %arg7[%596, %c0_124, %c0_125] : memref<8x8x32xbf16, #tpu.memory_space<vmem>>, vector<1x8x32xbf16>
    %598 = vector.shape_cast %597 : vector<1x8x32xbf16> to vector<8x32xbf16>
    %599 = vector.shape_cast %594 : vector<8x32xbf16> to vector<1x8x32xbf16>
    tpu.vector_store %arg7[%596, %c0_124, %c0_125], %599 {strides = array<i32>} : memref<8x8x32xbf16, #tpu.memory_space<vmem>>, vector<1x8x32xbf16>,
    %c7_i32_126 = arith.constant 7 : i32
    %600 = arith.index_cast %c7_i32_126 : i32 to index
    %c0_127 = arith.constant 0 : index
    %c0_128 = arith.constant 0 : index
    %601 = vector.load %arg2[%600, %c0_127, %c0_128] : memref<8x8x128xbf16, #tpu.memory_space<vmem>>, vector<1x8x128xbf16>
    %602 = vector.shape_cast %601 : vector<1x8x128xbf16> to vector<8x128xbf16>
    %603 = arith.extf %602 : vector<8x128xbf16> to vector<8x128xf32>
    %604 = arith.truncf %544 : vector<8x32xf32> to vector<8x32xbf16>
    %cst_129 = arith.constant dense<0.000000e+00> : vector<8x128xf32>
    %605 = tpu.matmul %604, %4, %cst_129 {dimension_numbers = #tpu.dot_dimension_numbers<[1], [0], [0], [1], [0, 0, 1, 1], [], []>} : vector<8x32xbf16>, vector<32x128xbf16>, vector<8x128xf32> -> vector<8x128xf32>
    %606 = arith.addf %603, %605 : vector<8x128xf32>
    %607 = vector.extract_strided_slice %606 {offsets = [0, 0], sizes = [8, 96], strides = [1, 1]} : vector<8x128xf32> to vector<8x96xf32>
    %608 = arith.negf %607 : vector<8x96xf32>
    %609 = math.exp %608 : vector<8x96xf32>
    %cst_130 = arith.constant 1.000000e+00 : f32
    %610 = vector.broadcast %cst_130 : f32 to vector<8x96xf32>
    %611 = arith.addf %610, %609 : vector<8x96xf32>
    %612 = arith.divf %610, %611 : vector<8x96xf32>
    %613 = vector.extract_strided_slice %606 {offsets = [0, 96], sizes = [8, 32], strides = [1, 1]} : vector<8x128xf32> to vector<8x32xf32>
    %614 = math.tanh %613 : vector<8x32xf32>
    %615 = vector.extract_strided_slice %612 {offsets = [0, 0], sizes = [8, 32], strides = [1, 1]} : vector<8x96xf32> to vector<8x32xf32>
    %616 = vector.extract_strided_slice %612 {offsets = [0, 32], sizes = [8, 32], strides = [1, 1]} : vector<8x96xf32> to vector<8x32xf32>
    %617 = vector.extract_strided_slice %612 {offsets = [0, 64], sizes = [8, 32], strides = [1, 1]} : vector<8x96xf32> to vector<8x32xf32>
    %618 = arith.mulf %616, %547 : vector<8x32xf32>
    %619 = arith.mulf %615, %614 : vector<8x32xf32>
    %620 = arith.addf %618, %619 : vector<8x32xf32>
    %621 = math.tanh %620 : vector<8x32xf32>
    %622 = arith.mulf %617, %621 : vector<8x32xf32>
    %623 = arith.addi %6, %c7_i32_126 : i32
    %624 = vector.broadcast %623 : i32 to vector<8x1xi32>
    %625 = arith.cmpi slt, %624, %3 : vector<8x1xi32>
    %626 = vector.shape_cast %625 : vector<8x1xi1> to vector<8x1xi1>
    %627 = vector.broadcast %626 : vector<8x1xi1> to vector<8x32xi1>
    %628 = arith.select %627, %622, %544 : vector<8x32xi1>, vector<8x32xf32>
    %629 = vector.shape_cast %625 : vector<8x1xi1> to vector<8x1xi1>
    %630 = vector.broadcast %629 : vector<8x1xi1> to vector<8x32xi1>
    %631 = arith.select %630, %620, %547 : vector<8x32xi1>, vector<8x32xf32>
    %cst_131 = arith.constant 0.000000e+00 : f32
    %632 = vector.shape_cast %625 : vector<8x1xi1> to vector<8x1xi1>
    %633 = vector.broadcast %632 : vector<8x1xi1> to vector<8x32xi1>
    %634 = vector.broadcast %cst_131 : f32 to vector<8x32xf32>
    %635 = arith.select %633, %622, %634 : vector<8x32xi1>, vector<8x32xf32>
    %636 = arith.truncf %635 : vector<8x32xf32> to vector<8x32xbf16>
    %637 = arith.index_cast %c7_i32_126 : i32 to index
    %c0_132 = arith.constant 0 : index
    %c0_133 = arith.constant 0 : index
    %638 = vector.load %arg6[%637, %c0_132, %c0_133] : memref<8x8x32xbf16, #tpu.memory_space<vmem>>, vector<1x8x32xbf16>
    %639 = vector.shape_cast %638 : vector<1x8x32xbf16> to vector<8x32xbf16>
    %640 = vector.shape_cast %636 : vector<8x32xbf16> to vector<1x8x32xbf16>
    tpu.vector_store %arg6[%637, %c0_132, %c0_133], %640 {strides = array<i32>} : memref<8x8x32xbf16, #tpu.memory_space<vmem>>, vector<1x8x32xbf16>,
    %c7_i32_134 = arith.constant 7 : i32
    %641 = arith.subi %c7_i32_134, %c7_i32_126 : i32
    %642 = arith.index_cast %641 : i32 to index
    %c0_135 = arith.constant 0 : index
    %c0_136 = arith.constant 0 : index
    %643 = vector.load %arg3[%642, %c0_135, %c0_136] : memref<8x8x128xbf16, #tpu.memory_space<vmem>>, vector<1x8x128xbf16>
    %644 = vector.shape_cast %643 : vector<1x8x128xbf16> to vector<8x128xbf16>
    %645 = arith.extf %644 : vector<8x128xbf16> to vector<8x128xf32>
    %646 = arith.truncf %586 : vector<8x32xf32> to vector<8x32xbf16>
    %cst_137 = arith.constant dense<0.000000e+00> : vector<8x128xf32>
    %647 = tpu.matmul %646, %5, %cst_137 {dimension_numbers = #tpu.dot_dimension_numbers<[1], [0], [0], [1], [0, 0, 1, 1], [], []>} : vector<8x32xbf16>, vector<32x128xbf16>, vector<8x128xf32> -> vector<8x128xf32>
    %648 = arith.addf %645, %647 : vector<8x128xf32>
    %649 = vector.extract_strided_slice %648 {offsets = [0, 0], sizes = [8, 96], strides = [1, 1]} : vector<8x128xf32> to vector<8x96xf32>
    %650 = arith.negf %649 : vector<8x96xf32>
    %651 = math.exp %650 : vector<8x96xf32>
    %cst_138 = arith.constant 1.000000e+00 : f32
    %652 = vector.broadcast %cst_138 : f32 to vector<8x96xf32>
    %653 = arith.addf %652, %651 : vector<8x96xf32>
    %654 = arith.divf %652, %653 : vector<8x96xf32>
    %655 = vector.extract_strided_slice %648 {offsets = [0, 96], sizes = [8, 32], strides = [1, 1]} : vector<8x128xf32> to vector<8x32xf32>
    %656 = math.tanh %655 : vector<8x32xf32>
    %657 = vector.extract_strided_slice %654 {offsets = [0, 0], sizes = [8, 32], strides = [1, 1]} : vector<8x96xf32> to vector<8x32xf32>
    %658 = vector.extract_strided_slice %654 {offsets = [0, 32], sizes = [8, 32], strides = [1, 1]} : vector<8x96xf32> to vector<8x32xf32>
    %659 = vector.extract_strided_slice %654 {offsets = [0, 64], sizes = [8, 32], strides = [1, 1]} : vector<8x96xf32> to vector<8x32xf32>
    %660 = arith.mulf %658, %589 : vector<8x32xf32>
    %661 = arith.mulf %657, %656 : vector<8x32xf32>
    %662 = arith.addf %660, %661 : vector<8x32xf32>
    %663 = math.tanh %662 : vector<8x32xf32>
    %664 = arith.mulf %659, %663 : vector<8x32xf32>
    %665 = arith.subi %7, %c7_i32_126 : i32
    %666 = vector.broadcast %665 : i32 to vector<8x1xi32>
    %667 = arith.cmpi slt, %666, %3 : vector<8x1xi32>
    %668 = vector.shape_cast %667 : vector<8x1xi1> to vector<8x1xi1>
    %669 = vector.broadcast %668 : vector<8x1xi1> to vector<8x32xi1>
    %670 = arith.select %669, %664, %586 : vector<8x32xi1>, vector<8x32xf32>
    %671 = vector.shape_cast %667 : vector<8x1xi1> to vector<8x1xi1>
    %672 = vector.broadcast %671 : vector<8x1xi1> to vector<8x32xi1>
    %673 = arith.select %672, %662, %589 : vector<8x32xi1>, vector<8x32xf32>
    %cst_139 = arith.constant 0.000000e+00 : f32
    %674 = vector.shape_cast %667 : vector<8x1xi1> to vector<8x1xi1>
    %675 = vector.broadcast %674 : vector<8x1xi1> to vector<8x32xi1>
    %676 = vector.broadcast %cst_139 : f32 to vector<8x32xf32>
    %677 = arith.select %675, %664, %676 : vector<8x32xi1>, vector<8x32xf32>
    %678 = arith.truncf %677 : vector<8x32xf32> to vector<8x32xbf16>
    %c7_i32_140 = arith.constant 7 : i32
    %679 = arith.subi %c7_i32_140, %c7_i32_126 : i32
    %680 = arith.index_cast %679 : i32 to index
    %c0_141 = arith.constant 0 : index
    %c0_142 = arith.constant 0 : index
    %681 = vector.load %arg7[%680, %c0_141, %c0_142] : memref<8x8x32xbf16, #tpu.memory_space<vmem>>, vector<1x8x32xbf16>
    %682 = vector.shape_cast %681 : vector<1x8x32xbf16> to vector<8x32xbf16>
    %683 = vector.shape_cast %678 : vector<8x32xbf16> to vector<1x8x32xbf16>
    tpu.vector_store %arg7[%680, %c0_141, %c0_142], %683 {strides = array<i32>} : memref<8x8x32xbf16, #tpu.memory_space<vmem>>, vector<1x8x32xbf16>,
    %c8_i32_143 = arith.constant 8 : i32
    %c0_144 = arith.constant 0 : index
    %c0_145 = arith.constant 0 : index
    %684 = vector.load %arg9[%c0_144, %c0_145] : memref<8x32xf32, #tpu.memory_space<vmem>>, vector<8x32xf32>
    tpu.vector_store %arg9[%c0_144, %c0_145], %628 {strides = array<i32>} : memref<8x32xf32, #tpu.memory_space<vmem>>, vector<8x32xf32>,
    %c0_146 = arith.constant 0 : index
    %c0_147 = arith.constant 0 : index
    %685 = vector.load %arg10[%c0_146, %c0_147] : memref<8x32xf32, #tpu.memory_space<vmem>>, vector<8x32xf32>
    tpu.vector_store %arg10[%c0_146, %c0_147], %631 {strides = array<i32>} : memref<8x32xf32, #tpu.memory_space<vmem>>, vector<8x32xf32>,
    %c0_148 = arith.constant 0 : index
    %c0_149 = arith.constant 0 : index
    %686 = vector.load %arg11[%c0_148, %c0_149] : memref<8x32xf32, #tpu.memory_space<vmem>>, vector<8x32xf32>
    tpu.vector_store %arg11[%c0_148, %c0_149], %670 {strides = array<i32>} : memref<8x32xf32, #tpu.memory_space<vmem>>, vector<8x32xf32>,
    %c0_150 = arith.constant 0 : index
    %c0_151 = arith.constant 0 : index
    %687 = vector.load %arg12[%c0_150, %c0_151] : memref<8x32xf32, #tpu.memory_space<vmem>>, vector<8x32xf32>
    tpu.vector_store %arg12[%c0_150, %c0_151], %673 {strides = array<i32>} : memref<8x32xf32, #tpu.memory_space<vmem>>, vector<8x32xf32>,
    %c0_i32_152 = arith.constant 0 : i32
    %688 = arith.cmpi eq, %arg0, %c0_i32_152 : i32
    %689 = arith.extui %688 : i1 to i32
    %c0_i32_153 = arith.constant 0 : i32
    %690 = arith.cmpi ne, %689, %c0_i32_153 : i32
    scf.if %690 {
      %c0_154 = arith.constant 0 : index
      %c0_155 = arith.constant 0 : index
      %c0_156 = arith.constant 0 : index
      %691 = vector.load %arg8[%c0_154, %c0_155, %c0_156] : memref<2x8x32xf32, #tpu.memory_space<vmem>>, vector<1x8x32xf32>
      %692 = vector.shape_cast %691 : vector<1x8x32xf32> to vector<8x32xf32>
      %693 = vector.shape_cast %628 : vector<8x32xf32> to vector<1x8x32xf32>
      tpu.vector_store %arg8[%c0_154, %c0_155, %c0_156], %693 {strides = array<i32>} : memref<2x8x32xf32, #tpu.memory_space<vmem>>, vector<1x8x32xf32>,
      %c1 = arith.constant 1 : index
      %c0_157 = arith.constant 0 : index
      %c0_158 = arith.constant 0 : index
      %694 = vector.load %arg8[%c1, %c0_157, %c0_158] : memref<2x8x32xf32, #tpu.memory_space<vmem>>, vector<1x8x32xf32>
      %695 = vector.shape_cast %694 : vector<1x8x32xf32> to vector<8x32xf32>
      %696 = vector.shape_cast %670 : vector<8x32xf32> to vector<1x8x32xf32>
      tpu.vector_store %arg8[%c1, %c0_157, %c0_158], %696 {strides = array<i32>} : memref<2x8x32xf32, #tpu.memory_space<vmem>>, vector<1x8x32xf32>,
    } else {
    }
    return
  }
  func.func @transform_0(%arg0: i32) -> (i32, i32) {
    %c0_i32 = arith.constant 0 : i32
    %c0_i32_0 = arith.constant 0 : i32
    %c0_i32_1 = arith.constant 0 : i32
    return %c0_i32, %c0_i32_0 : i32, i32
  }
  func.func @transform_1(%arg0: i32) -> (i32, i32, i32) {
    %c0_i32 = arith.constant 0 : i32
    %c0_i32_0 = arith.constant 0 : i32
    %c0_i32_1 = arith.constant 0 : i32
    return %arg0, %c0_i32, %c0_i32_0 : i32, i32, i32
  }
  func.func @transform_2(%arg0: i32) -> (i32, i32, i32) {
    %c0_i32 = arith.constant 0 : i32
    %0 = arith.subi %c0_i32, %arg0 : i32
    %c0_i32_0 = arith.constant 0 : i32
    %c0_i32_1 = arith.constant 0 : i32
    %c0_i32_2 = arith.constant 0 : i32
    return %0, %c0_i32_0, %c0_i32_1 : i32, i32, i32
  }
  func.func @transform_3(%arg0: i32) -> (i32, i32) {
    %c0_i32 = arith.constant 0 : i32
    %c0_i32_0 = arith.constant 0 : i32
    %c0_i32_1 = arith.constant 0 : i32
    return %c0_i32, %c0_i32_0 : i32, i32
  }
  func.func @transform_4(%arg0: i32) -> (i32, i32) {
    %c0_i32 = arith.constant 0 : i32
    %c0_i32_0 = arith.constant 0 : i32
    %c0_i32_1 = arith.constant 0 : i32
    return %c0_i32, %c0_i32_0 : i32, i32
  }
  func.func @transform_5(%arg0: i32) -> (i32, i32, i32) {
    %c0_i32 = arith.constant 0 : i32
    %c0_i32_0 = arith.constant 0 : i32
    %c0_i32_1 = arith.constant 0 : i32
    return %arg0, %c0_i32, %c0_i32_0 : i32, i32, i32
  }
  func.func @transform_6(%arg0: i32) -> (i32, i32, i32) {
    %c0_i32 = arith.constant 0 : i32
    %0 = arith.subi %c0_i32, %arg0 : i32
    %c0_i32_0 = arith.constant 0 : i32
    %c0_i32_1 = arith.constant 0 : i32
    %c0_i32_2 = arith.constant 0 : i32
    return %0, %c0_i32_0, %c0_i32_1 : i32, i32, i32
  }
  func.func @transform_7(%arg0: i32) -> (i32, i32, i32) {
    %c0_i32 = arith.constant 0 : i32
    %c0_i32_0 = arith.constant 0 : i32
    %c0_i32_1 = arith.constant 0 : i32
    %c0_i32_2 = arith.constant 0 : i32
    return %c0_i32, %c0_i32_0, %c0_i32_1 : i32, i32, i32
  }
}

</mosaic_0001>

<bundles_post_ra>
// kernel: tpu_custom_call.1
= control target key start
LH: loop header
LB: loop body
LE: loop exit
PB: predicated region body
PF: predicated region fallthrough
CT: control target
= control target key end

     0   :  { %13 = vsyncpa [#allocation7], 0  ;;  %s3100_s0 = inlined_call_operand.vmem [shape: s32[8,1], index: 0, kind: input, shape index: {}]   ;;  %s3101_s1 = inlined_call_operand.hbm [shape: bf16[8,8,128], index: 1, kind: input, shape index: {}]   ;;  %s3102_s2 = inlined_call_operand.hbm [shape: bf16[8,8,128], index: 2, kind: input, shape index: {}]   ;;  %s3103_s3 = inlined_call_operand.hbm [shape: bf16[32,128], index: 3, kind: input, shape index: {}]   ;;  %s3104_s4 = inlined_call_operand.vmem [shape: bf16[32,128], index: 4, kind: input, shape index: {}]   ;;  %s3105_s5 = inlined_call_operand.hbm [shape: bf16[8,8,32], index: 5, kind: output, shape index: {0}]   ;;  %s3106_s6 = inlined_call_operand.hbm [shape: bf16[8,8,32], index: 6, kind: output, shape index: {1}]   ;;  %s3107_s7 = inlined_call_operand.hbm [shape: f32[2,8,32], index: 7, kind: output, shape index: {2}]  }
   0x1   :  { %14 = vsyncpa [#allocation10], 0 }
   0x2   :  { %15 = vsyncpa [#allocation8], 0 }
   0x3   :  { %16 = vsyncpa [#allocation14], 0  ;;  %s2273_s24 = smov [#allocation9]   ;;  %s2274_s26 = smov [#allocation6]  }
   0x4   :  { %s40_s25 = sshll.u32 %s2273_s24, 4  ;;  %s24_s27 = sshll.u32 %s2274_s26, 4  ;;  %s41_s25 = int_to_ptr.vmem [resolvable:$true] %s40_s25  ;;  %s25_s27 = int_to_ptr.vmem [resolvable:$true] %s24_s27 }
   0x5   :  { %s2153_s28 = scalar_lea.vmem %s41_s25, 512  ;;  %p2158_p1 = scmp.lt.s32.totalorder %s41_s25, %s41_s25 }
   0x6   :  { %p2154_p0 = scmp.ne.s32.totalorder %s41_s25, %s2153_s28  ;;  %p2159_p2 = scmp.lt.s32.totalorder %s2153_s28, %s2153_s28 }
   0x8   :  { %p2160_p3 = por %p2159_p2, %p2158_p1 }
   0xa   :  { %p2161_p4 = pnand %p2160_p3, %p2154_p0 }
   0xc   :  { %2164 = shalt.err (!%p2161_p4)
}
   0xd   :  { %s2275_s29 = smov 64   ;;  %s2276_s30 = smov 4  }
   0xe   :  { %46 = dma.hbm_to_vmem [thread:$0]  %s3102_s2, 512, %s41_s25, [#allocation10], %s2275_s29, %s2275_s29, %s2276_s30  }
   0xf   :  { %s2173_s10 = scalar_lea.vmem %s25_s27, 512  ;;  %p2178_p6 = scmp.lt.s32.totalorder %s25_s27, %s25_s27 }
  0x10   :  { %p2174_p5 = scmp.ne.s32.totalorder %s25_s27, %s2173_s10  ;;  %p2179_p7 = scmp.lt.s32.totalorder %s2173_s10, %s2173_s10 }
  0x12   :  { %p2180_p8 = por %p2179_p7, %p2178_p6 }
  0x14   :  { %p2181_p9 = pnand %p2180_p8, %p2174_p5 }
  0x16   :  { %2184 = shalt.err (!%p2181_p9)
}
  0x17   :  { %30 = dma.hbm_to_vmem [thread:$0]  %s3101_s1, 512, %s25_s27, [#allocation7], %s2275_s29, %s2275_s29, %s2276_s30  }
  0x18   :  { %s2277_s13 = smov [#allocation11]  }
  0x19   :  { %s52_s14 = sshll.u32 %s2277_s13, 4  ;;  %s53_s14 = int_to_ptr.vmem [resolvable:$true] %s52_s14 }
  0x1a   :  { %s2193_s15 = scalar_lea.vmem %s53_s14, 256  ;;  %p2198_p11 = scmp.lt.s32.totalorder %s53_s14, %s53_s14 }
  0x1b   :  { %p2194_p10 = scmp.ne.s32.totalorder %s53_s14, %s2193_s15  ;;  %p2199_p12 = scmp.lt.s32.totalorder %s2193_s15, %s2193_s15 }
  0x1d   :  { %p2200_p13 = por %p2199_p12, %p2198_p11 }
  0x1f   :  { %p2201_p0 = pnand %p2200_p13, %p2194_p10 }
  0x21   :  { %2204 = shalt.err (!%p2201_p0)
}
  0x22   :  { %58 = dma.hbm_to_vmem [thread:$0]  %s3103_s3, 256, %s53_s14, [#allocation10], %s2275_s29, %s2275_s29, %s2276_s30  }
  0x23   :  { %2265 = dma.done.wait [#allocation7], 512  }
  0x24   :  { %2266 = vsyncadd [#allocation7], 4294966784 }
  0x25   :  { %2267 = dma.done.wait [#allocation10], 768  }
  0x26   :  { %2268 = vsyncadd [#allocation10], 4294966528  ;;  %vm79_vm0 = vcmask 261120   ;;  %v2278_v0 = vmov 0.0   ;;  %vm2279_vm1 = vmmov 0   ;;  %v2360_v1 = vld [vmem:[#allocation11 + $0x8] sm:$0xff]  }
  0x27   :  { %1864 = vmatprep.subr.bf16.mxu0 %v2278_v0  ;;  %1872 = vmatprep.subr.bf16.mxu1 %v2278_v0  ;;  %80 = vst.msk [vmem:[#allocation2] sm:$0xff] %vm79_vm0, %v2278_v0  ;;  %81 = vst.msk [vmem:[#allocation3] sm:$0xff] %vm79_vm0, %v2278_v0  ;;  %v2365_v2 = vld [vmem:[%s3104_s4 + $0x8] sm:$0xff]   ;;  %v2368_v3 = vld [vmem:[#allocation11] sm:$0xff]   ;;  %s2280_s19 = smov 32   ;;  %v2281_v25 = vmov 0  }
  0x28   :  { %82 = vst.msk [vmem:[#allocation4] sm:$0xff] %vm79_vm0, %v2278_v0  ;;  %83 = vst.msk [vmem:[#allocation5] sm:$0xff] %vm79_vm0, %v2278_v0  ;;  %1868 = vmatprep.mubr.msk.bf16.mxu0 %vm2279_vm1, %v2278_v0  ;;  %1876 = vmatprep.mubr.msk.bf16.mxu1 %vm2279_vm1, %v2278_v0  ;;  %v2375_v4 = vld [vmem:[%s3104_s4] sm:$0xff]   ;;  %v2406_v11 = vld [vmem:[#allocation6] sm:$0xff]   ;;  %s2283_s25 = smov [#allocation13]   ;;  %s2284_s27 = smov [#allocation15]  }
  0x29   :  { %1865 = vmatpush3.bf16.msra.mxu0 %v2360_v1  ;;  %1873 = vmatpush3.bf16.msra.mxu1 %v2365_v2  ;;  %v2408_v12 = vld [vmem:[#allocation9 + $0x18] sm:$0xff]   ;;  %v100_v13 = vunpack.c.l.bf16 %v2406_v11  ;;  %v2419_v34 = vld [vmem:[%s3100_s0] sm:$0xff]  ;;  %s1696_s26 = sshll.u32 %s2283_s25, 4  ;;  %s1708_s28 = sshll.u32 %s2284_s27, 4  ;;  %s1697_s26 = int_to_ptr.vmem [resolvable:$true] %s1696_s26  ;;  %s1709_s28 = int_to_ptr.vmem [resolvable:$true] %s1708_s28 }
  0x2a   :  { %1866 = vmatprep.subr.bf16.mxu0 %v2278_v0  ;;  %1874 = vmatprep.subr.bf16.mxu1 %v2278_v0  ;;  %v212_v14 = vunpack.c.h.bf16 %v2408_v12  ;;  %vm1742_vm2 = vcmp.gt.s32.totalorder %v2419_v34, 7  ;;  %vm1736_vm3 = vcmp.gt.s32.totalorder %v2419_v34, 0  ;;  %vm1750_vm6 = vcmp.gt.s32.totalorder %v2419_v34, 6  ;;  %s2285_s8 = smov [#allocation12]   ;;  %s2205_s10 = scalar_lea.vmem %s1697_s26, 512 }
  0x2b   :  { %2007 = vset.pattern.permute.xlu0 %v2281_v25  ;;  %2008 = vset.pattern.permute.xlu1 %v2281_v25  ;;  %v2424_v40 = vsel %vm1742_vm2, 1, %v2281_v25  ;;  %v2430_v42 = vsel %vm1736_vm3, 1, %v2281_v25  ;;  %vm1746_vm7 = vcmp.gt.s32.totalorder %v2419_v34, 1  ;;  %vm1758_vm10 = vcmp.gt.s32.totalorder %v2419_v34, 5  ;;  %s1680_s9 = sshll.u32 %s2285_s8, 4  ;;  %p2206_p1 = scmp.ne.s32.totalorder %s1697_s26, %s2205_s10  ;;  %s3075_s9 = int_to_ptr.vmem [resolvable:$true] %s1680_s9 }
  0x2c   :  { %vm1754_vm11 = vcmp.gt.s32.totalorder %v2419_v34, 2  ;;  %vm1766_vm14 = vcmp.gt.s32.totalorder %v2419_v34, 4  ;;  %vm1762_vm15 = vcmp.gt.s32.totalorder %v2419_v34, 3  ;;  %p2210_p2 = scmp.lt.s32.totalorder %s1697_s26, %s1697_s26  ;;  %p2211_p3 = scmp.lt.s32.totalorder %s2205_s10, %s2205_s10 }
  0x2d   :  { %1867 = vmatpush3.bf16.msra.mxu0 %v2368_v3  ;;  %1875 = vmatpush3.bf16.msra.mxu1 %v2375_v4 }
  0x2e   :  { %v2378_v5 = vld [vmem:[#allocation2] sm:$0xff]  ;;  %v96_v10 = vld [vmem:[#allocation3] sm:$0xff]  ;;  %1880 = vmatprep.subr.bf16.mxu0 %v2278_v0  ;;  %1888 = vmatprep.subr.bf16.mxu1 %v2278_v0  ;;  %p2212_p4 = por %p2211_p3, %p2210_p2 }
  0x2f   :  { %v2380_v6 = vld [vmem:[#allocation4] sm:$0xff]  ;;  %v98_v7 = vld [vmem:[#allocation5] sm:$0xff]  ;;  %v101_v8 = vpack.c.bf16 %v2378_v5, %v2378_v5 }
  0x30   :  { %278 = vrot.lane.b32.xlu1 %v98_v7, %s2280_s19  ;;  %v213_v9 = vpack.c.bf16 %v2380_v6, %v2380_v6  ;;  %p2213_p5 = pnand %p2212_p4, %p2206_p1 }
  0x31   :  { %1869 = vmatmul.mubr.msk.bf16.vlgmr.msra.gmra.mxu0 %vm79_vm0, %v101_v8  ;;  %v418_v8 = vunpack.c.l.bf16 %v2408_v12 }
  0x32   :  { %1877 = vmatmul.mubr.msk.bf16.vlgmr.msra.gmra.mxu1 %vm79_vm0, %v213_v9  ;;  %1881 = vmatpush3.bf16.msra.mxu0 %v2360_v1 }
  0x33   :  { %1889 = vmatpush3.bf16.msra.mxu1 %v2365_v2  ;;  %1892 = vmatprep.mubr.msk.bf16.mxu1 %vm2279_vm1, %v2278_v0 }
  0x34   :  { %167 = vrot.lane.b32.xlu1 %v96_v10, %s2280_s19  ;;  %1890 = vmatprep.subr.bf16.mxu1 %v2278_v0 }
  0x35   :  { %1882 = vmatprep.subr.bf16.mxu0 %v2278_v0  ;;  %1884 = vmatprep.mubr.msk.bf16.mxu0 %vm2279_vm1, %v2278_v0 }
  0x36   :  { %1883 = vmatpush3.bf16.msra.mxu0 %v2368_v3 }
  0x37   :  { %1891 = vmatpush3.bf16.msra.mxu1 %v2375_v4  ;;  %1896 = vmatprep.subr.bf16.mxu0 %v2278_v0 }
  0x38   :  { %1904 = vmatprep.subr.bf16.mxu1 %v2278_v0 }
  0xa2   :  { %v2433_v43 = vpop.permute.xlu1 %278 }
  0xa6   :  { %v2436_v45 = vpop.permute.xlu1 %167 }
  0xf1   :  { %v152_v15 = vpop.f32.mrf.mxu0 }
  0xf2   :  { %v263_v16 = vpop.f32.mrf.mxu1  ;;  %v158_v17 = vadd.f32 %v152_v15, %v100_v13  ;;  %v323_v13 = vunpack.c.h.bf16 %v2406_v11 }
  0xf3   :  { %v269_v18 = vadd.f32 %v263_v16, %v212_v14  ;;  %v1870_v19 = vpop.f32.mrf.mxu0 }
  0xf4   :  { %v1878_v20 = vpop.f32.mrf.mxu1  ;;  %v1735_v29 = vmul.f32 -1.442695, %v158_v17 }
  0xf5   :  { %2013 = vtanh.f32 %v269_v18  ;;  %v155_v21 = vpop.f32.mrf.mxu0  ;;  %v1741_v28 = vmul.f32 -1.442695, %v269_v18 }
  0xf6   :  { %v266_v22 = vpop.f32.mrf.mxu1  ;;  %2015 = vtanh.f32 %v158_v17 }
  0xf7   :  { %v1871_v23 = vpop.f32.mrf.mxu0  ;;  %2017 = vpow2.f32 %v1741_v28 }
  0xf8   :  { %v1879_v24 = vpop.f32.mrf.mxu1  ;;  %2019 = vpow2.f32 %v1735_v29 }
 0x102   :  { %v2014_v26 = vpop.eup %2013 }
 0x103   :  { %283 = vrot.lane.b32.xlu0 %v2014_v26, %s2280_s19  ;;  %v2016_v27 = vpop.eup %2015 }
 0x104   :  { %v2018_v30 = vpop.eup %2017 }
 0x105   :  { %v273_v31 = vadd.f32 1.0, %v2018_v30  ;;  %v2020_v32 = vpop.eup %2019 }
 0x106   :  { %v162_v33 = vadd.f32 1.0, %v2020_v32 }
 0x107   :  { %172 = vrot.lane.b32.xlu0 %v2016_v27, %s2280_s19  ;;  %2021 = vrcp.f32 %v273_v31 }
 0x108   :  { %2023 = vrcp.f32 %v162_v33 }
 0x114   :  { %v2022_v35 = vpop.eup %2021 }
 0x115   :  { %v2024_v38 = vpop.eup %2023  ;;  %v281_v44 = vmul.f32 %v2022_v35, %v2433_v43 }
 0x116   :  { %v170_v48 = vmul.f32 %v2024_v38, %v2436_v45 }
 0x175   :  { %v284_v36 = vpop.permute.xlu0 %283 }
 0x176   :  { %v286_v37 = vmul.f32 %v2022_v35, %v284_v36 }
 0x178   :  { %288 = vrot.lane.b32.xlu0 %v286_v37, %s2280_s19  ;;  %v2504_v37 = vsel %vm1746_vm7, 1, %v2281_v25 }
 0x179   :  { %v173_v39 = vpop.permute.xlu0 %172 }
 0x17a   :  { %v175_v41 = vmul.f32 %v2024_v38, %v173_v39 }
 0x17c   :  { %302 = vperm.xlu0 %2007, %v2424_v40   ;;  %177 = vrot.lane.b32.xlu1 %v175_v41, %s2280_s19 }
 0x180   :  { %191 = vperm.xlu1 %2008, %v2430_v42  }
 0x1ea   :  { %v289_v46 = vpop.permute.xlu0 %288 }
 0x1eb   :  { %v2438_v47 = vadd.f32 %v289_v46, %v281_v44 }
 0x1ed   :  { %2025 = vtanh.f32 %v2438_v47 }
 0x1ee   :  { %v178_v49 = vpop.permute.xlu1 %177 }
 0x1ef   :  { %v2442_v50 = vadd.f32 %v178_v49, %v170_v48 }
 0x1f1   :  { %2027 = vtanh.f32 %v2442_v50 }
 0x1f7   :  { %v2453_v54 = vpop.permute.xlu0 %302 }
 0x1f8   :  { %vm304_vm4 = vcmp.eq.s32.totalorder %v2453_v54, 1 }
 0x1fa   :  { %v2026_v51 = vpop.eup %2025 }
 0x1fb   :  { %294 = vrot.lane.b32.xlu1 %v2026_v51, %s2280_s19  ;;  %v2451_v53 = vpop.permute.xlu1 %191 }
 0x1fc   :  { %vm193_vm5 = vcmp.eq.s32.totalorder %v2451_v53, 1 }
 0x1fd   :  { %v2520_v46 = vsel %vm193_vm5, %v2442_v50, %v2436_v45 }
 0x1fe   :  { %v2028_v52 = vpop.eup %2027 }
 0x1ff   :  { %306 = vrot.lane.b32.xlu1 %v2380_v6, %s2275_s29  ;;  %183 = vrot.lane.b32.xlu0 %v2028_v52, %s2280_s19 }
 0x203   :  { %195 = vrot.lane.b32.xlu0 %v2378_v5, %s2275_s29 }
 0x26d   :  { %v295_v55 = vpop.permute.xlu1 %294 }
 0x26e   :  { %v2455_v56 = vmul.f32 %v2022_v35, %v295_v55  ;;  %v2498_v35 = vsel %vm1750_vm6, 1, %v2281_v25 }
 0x271   :  { %v307_v57 = vpop.permute.xlu1 %306  ;;  %v184_v58 = vpop.permute.xlu0 %183 }
 0x272   :  { %v2461_v59 = vsel %vm304_vm4, %v2455_v56, %v307_v57  ;;  %v2465_v61 = vmul.f32 %v2024_v38, %v184_v58  ;;  %v2511_v38 = vsel %vm304_vm4, %v2438_v47, %v2433_v43 }
 0x273   :  { %v419_v60 = vpack.c.bf16 %v2461_v59, %v2461_v59 }
 0x275   :  { %421 = vrot.lane.b32.xlu1 %v419_v60, %s2275_s29  ;;  %v196_v62 = vpop.permute.xlu0 %195 }
 0x276   :  { %v2472_v63 = vsel %vm193_vm5, %v2465_v61, %v196_v62 }
 0x277   :  { %v324_v5 = vpack.c.bf16 %v2472_v63, %v2472_v63 }
 0x279   :  { %326 = vrot.lane.b32.xlu0 %v324_v5, %s2275_s29 }
 0x2e7   :  { %v422_v6 = vpop.permute.xlu1 %421 }
 0x2e8   :  { %1893 = vmatmul.mubr.msk.bf16.vlgmr.msra.gmra.mxu1 %vm79_vm0, %v422_v6 }
 0x2e9   :  { %1905 = vmatpush3.bf16.msra.mxu1 %v2365_v2  ;;  %1908 = vmatprep.mubr.msk.bf16.mxu1 %vm2279_vm1, %v2278_v0 }
 0x2ea   :  { %1906 = vmatprep.subr.bf16.mxu1 %v2278_v0 }
 0x2eb   :  { %v327_v7 = vpop.permute.xlu0 %326 }
 0x2ec   :  { %1885 = vmatmul.mubr.msk.bf16.vlgmr.msra.gmra.mxu0 %vm79_vm0, %v327_v7 }
 0x2ed   :  { %1907 = vmatpush3.bf16.msra.mxu1 %v2375_v4  ;;  %1897 = vmatpush3.bf16.msra.mxu0 %v2360_v1 }
 0x2ee   :  { %1898 = vmatprep.subr.bf16.mxu0 %v2278_v0  ;;  %1900 = vmatprep.mubr.msk.bf16.mxu0 %vm2279_vm1, %v2278_v0 }
 0x2ef   :  { %1920 = vmatprep.subr.bf16.mxu1 %v2278_v0 }
 0x2f1   :  { %1899 = vmatpush3.bf16.msra.mxu0 %v2368_v3 }
 0x2f2   :  { %1912 = vmatprep.subr.bf16.mxu0 %v2278_v0 }
 0x3a8   :  { %v460_v9 = vpop.f32.mrf.mxu1 }
 0x3a9   :  { %v466_v10 = vadd.f32 %v460_v9, %v418_v8  ;;  %v2574_v9 = vld [vmem:[#allocation6 + $0x8] sm:$0xff]  }
 0x3aa   :  { %v1894_v14 = vpop.f32.mrf.mxu1 }
 0x3ab   :  { %2029 = vtanh.f32 %v466_v10  ;;  %v1749_v12 = vmul.f32 -1.442695, %v466_v10  ;;  %v513_v14 = vunpack.c.l.bf16 %v2574_v9 }
 0x3ac   :  { %v365_v15 = vpop.f32.mrf.mxu0  ;;  %v463_v16 = vpop.f32.mrf.mxu1 }
 0x3ad   :  { %v371_v17 = vadd.f32 %v365_v15, %v323_v13 }
 0x3ae   :  { %v1886_v18 = vpop.f32.mrf.mxu0  ;;  %v1895_v19 = vpop.f32.mrf.mxu1 }
 0x3af   :  { %2031 = vtanh.f32 %v371_v17  ;;  %v1745_v24 = vmul.f32 -1.442695, %v371_v17 }
 0x3b0   :  { %v368_v20 = vpop.f32.mrf.mxu0  ;;  %2033 = vpow2.f32 %v1749_v12 }
 0x3b1   :  { %2035 = vpow2.f32 %v1745_v24 }
 0x3b2   :  { %v1887_v21 = vpop.f32.mrf.mxu0 }
 0x3b8   :  { %v2030_v22 = vpop.eup %2029 }
 0x3b9   :  { %476 = vrot.lane.b32.xlu1 %v2030_v22, %s2280_s19 }
 0x3bc   :  { %v2032_v23 = vpop.eup %2031 }
 0x3bd   :  { %381 = vrot.lane.b32.xlu0 %v2032_v23, %s2280_s19  ;;  %v2034_v11 = vpop.eup %2033 }
 0x3be   :  { %v470_v26 = vadd.f32 1.0, %v2034_v11  ;;  %v2036_v27 = vpop.eup %2035 }
 0x3bf   :  { %v375_v28 = vadd.f32 1.0, %v2036_v27 }
 0x3c0   :  { %2037 = vrcp.f32 %v470_v26 }
 0x3c1   :  { %2039 = vrcp.f32 %v375_v28 }
 0x3cd   :  { %v2038_v29 = vpop.eup %2037 }
 0x3ce   :  { %v2040_v32 = vpop.eup %2039  ;;  %v474_v39 = vmul.f32 %v2038_v29, %v2511_v38 }
 0x3cf   :  { %v379_v48 = vmul.f32 %v2040_v32, %v2520_v46 }
 0x42b   :  { %v477_v30 = vpop.permute.xlu1 %476 }
 0x42c   :  { %v479_v31 = vmul.f32 %v2038_v29, %v477_v30 }
 0x42e   :  { %481 = vrot.lane.b32.xlu1 %v479_v31, %s2280_s19 }
 0x42f   :  { %v382_v33 = vpop.permute.xlu0 %381 }
 0x430   :  { %v384_v36 = vmul.f32 %v2040_v32, %v382_v33 }
 0x432   :  { %496 = vperm.xlu1 %2008, %v2498_v35   ;;  %386 = vrot.lane.b32.xlu0 %v384_v36, %s2280_s19 }
 0x436   :  { %401 = vperm.xlu0 %2007, %v2504_v37  }
 0x4a0   :  { %v482_v41 = vpop.permute.xlu1 %481 }
 0x4a1   :  { %v2514_v44 = vadd.f32 %v482_v41, %v474_v39  ;;  %v2582_v39 = vsel %vm1758_vm10, 1, %v2281_v25 }
 0x4a3   :  { %2041 = vtanh.f32 %v2514_v44 }
 0x4a4   :  { %v387_v49 = vpop.permute.xlu0 %386 }
 0x4a5   :  { %v2524_v51 = vadd.f32 %v387_v49, %v379_v48  ;;  %v2588_v48 = vsel %vm1754_vm11, 1, %v2281_v25 }
 0x4a7   :  { %2043 = vtanh.f32 %v2524_v51 }
 0x4ad   :  { %v2529_v52 = vpop.permute.xlu1 %496 }
 0x4ae   :  { %vm498_vm8 = vcmp.eq.s32.totalorder %v2529_v52, 1 }
 0x4af   :  { %v2595_v49 = vsel %vm498_vm8, %v2514_v44, %v2511_v38 }
 0x4b0   :  { %v2042_v43 = vpop.eup %2041 }
 0x4b1   :  { %487 = vrot.lane.b32.xlu1 %v2042_v43, %s2280_s19  ;;  %v2531_v55 = vpop.permute.xlu0 %401 }
 0x4b2   :  { %vm403_vm9 = vcmp.eq.s32.totalorder %v2531_v55, 1 }
 0x4b4   :  { %v2044_v47 = vpop.eup %2043 }
 0x4b5   :  { %392 = vrot.lane.b32.xlu0 %v2044_v47, %s2280_s19 }
 0x523   :  { %v488_v45 = vpop.permute.xlu1 %487 }
 0x524   :  { %v2533_v50 = vmul.f32 %v2038_v29, %v488_v45 }
 0x526   :  { %v2540_v57 = vsel %vm498_vm8, %v2533_v50, %v2461_v59 }
 0x527   :  { %v393_v58 = vpop.permute.xlu0 %392  ;;  %v609_v60 = vpack.c.bf16 %v2540_v57, %v2540_v57 }
 0x528   :  { %v2544_v62 = vmul.f32 %v2040_v32, %v393_v58  ;;  %v2604_v58 = vsel %vm403_vm9, %v2524_v51, %v2520_v46 }
 0x529   :  { %611 = vrot.lane.b32.xlu1 %v609_v60, %s2275_s29 }
 0x52a   :  { %v2552_v5 = vsel %vm403_vm9, %v2544_v62, %v2472_v63  ;;  %v2571_v63 = vld [vmem:[#allocation9 + $0x10] sm:$0xff]  }
 0x52b   :  { %v514_v59 = vpack.c.bf16 %v2552_v5, %v2552_v5  ;;  %v608_v8 = vunpack.c.h.bf16 %v2571_v63 }
 0x52d   :  { %516 = vrot.lane.b32.xlu0 %v514_v59, %s2275_s29 }
 0x59b   :  { %v612_v6 = vpop.permute.xlu1 %611 }
 0x59c   :  { %1909 = vmatmul.mubr.msk.bf16.vlgmr.msra.gmra.mxu1 %vm79_vm0, %v612_v6 }
 0x59d   :  { %1921 = vmatpush3.bf16.msra.mxu1 %v2365_v2  ;;  %1924 = vmatprep.mubr.msk.bf16.mxu1 %vm2279_vm1, %v2278_v0 }
 0x59e   :  { %1922 = vmatprep.subr.bf16.mxu1 %v2278_v0 }
 0x59f   :  { %v517_v7 = vpop.permute.xlu0 %516 }
 0x5a0   :  { %1901 = vmatmul.mubr.msk.bf16.vlgmr.msra.gmra.mxu0 %vm79_vm0, %v517_v7 }
 0x5a1   :  { %1923 = vmatpush3.bf16.msra.mxu1 %v2375_v4  ;;  %1913 = vmatpush3.bf16.msra.mxu0 %v2360_v1 }
 0x5a2   :  { %1914 = vmatprep.subr.bf16.mxu0 %v2278_v0  ;;  %1916 = vmatprep.mubr.msk.bf16.mxu0 %vm2279_vm1, %v2278_v0 }
 0x5a3   :  { %1936 = vmatprep.subr.bf16.mxu1 %v2278_v0 }
 0x5a5   :  { %1915 = vmatpush3.bf16.msra.mxu0 %v2368_v3 }
 0x5a6   :  { %1928 = vmatprep.subr.bf16.mxu0 %v2278_v0 }
 0x65c   :  { %v650_v10 = vpop.f32.mrf.mxu1 }
 0x65d   :  { %v656_v13 = vadd.f32 %v650_v10, %v608_v8 }
 0x65e   :  { %v1910_v15 = vpop.f32.mrf.mxu1 }
 0x65f   :  { %2045 = vtanh.f32 %v656_v13  ;;  %v1757_v24 = vmul.f32 -1.442695, %v656_v13 }
 0x660   :  { %v555_v16 = vpop.f32.mrf.mxu0  ;;  %v653_v17 = vpop.f32.mrf.mxu1 }
 0x661   :  { %v561_v18 = vadd.f32 %v555_v16, %v513_v14 }
 0x662   :  { %v1902_v19 = vpop.f32.mrf.mxu0  ;;  %v1911_v20 = vpop.f32.mrf.mxu1 }
 0x663   :  { %2047 = vtanh.f32 %v561_v18  ;;  %v1753_v11 = vmul.f32 -1.442695, %v561_v18 }
 0x664   :  { %v558_v21 = vpop.f32.mrf.mxu0  ;;  %2049 = vpow2.f32 %v1757_v24 }
 0x665   :  { %2051 = vpow2.f32 %v1753_v11  ;;  %v703_v21 = vunpack.c.h.bf16 %v2574_v9 }
 0x666   :  { %v1903_v22 = vpop.f32.mrf.mxu0 }
 0x66c   :  { %v2046_v23 = vpop.eup %2045 }
 0x66d   :  { %666 = vrot.lane.b32.xlu1 %v2046_v23, %s2280_s19 }
 0x670   :  { %v2048_v12 = vpop.eup %2047 }
 0x671   :  { %571 = vrot.lane.b32.xlu0 %v2048_v12, %s2280_s19  ;;  %v2050_v26 = vpop.eup %2049 }
 0x672   :  { %v660_v27 = vadd.f32 1.0, %v2050_v26  ;;  %v2052_v28 = vpop.eup %2051 }
 0x673   :  { %v565_v29 = vadd.f32 1.0, %v2052_v28 }
 0x674   :  { %2053 = vrcp.f32 %v660_v27 }
 0x675   :  { %2055 = vrcp.f32 %v565_v29 }
 0x681   :  { %v2054_v30 = vpop.eup %2053 }
 0x682   :  { %v2056_v33 = vpop.eup %2055  ;;  %v664_v43 = vmul.f32 %v2054_v30, %v2595_v49 }
 0x683   :  { %v569_v60 = vmul.f32 %v2056_v33, %v2604_v58 }
 0x6df   :  { %v667_v31 = vpop.permute.xlu1 %666 }
 0x6e0   :  { %v669_v32 = vmul.f32 %v2054_v30, %v667_v31 }
 0x6e2   :  { %671 = vrot.lane.b32.xlu1 %v669_v32, %s2280_s19 }
 0x6e3   :  { %v572_v36 = vpop.permute.xlu0 %571 }
 0x6e4   :  { %v574_v41 = vmul.f32 %v2056_v33, %v572_v36 }
 0x6e6   :  { %686 = vperm.xlu1 %2008, %v2582_v39   ;;  %576 = vrot.lane.b32.xlu0 %v574_v41, %s2280_s19 }
 0x6ea   :  { %591 = vperm.xlu0 %2007, %v2588_v48  }
 0x754   :  { %v672_v47 = vpop.permute.xlu1 %671 }
 0x755   :  { %v2598_v45 = vadd.f32 %v672_v47, %v664_v43 }
 0x757   :  { %2057 = vtanh.f32 %v2598_v45 }
 0x758   :  { %v577_v59 = vpop.permute.xlu0 %576 }
 0x759   :  { %v2608_v6 = vadd.f32 %v577_v59, %v569_v60 }
 0x75b   :  { %2059 = vtanh.f32 %v2608_v6 }
 0x761   :  { %v2613_v7 = vpop.permute.xlu1 %686 }
 0x762   :  { %vm688_vm12 = vcmp.eq.s32.totalorder %v2613_v7, 1 }
 0x764   :  { %v2058_v38 = vpop.eup %2057 }
 0x765   :  { %677 = vrot.lane.b32.xlu1 %v2058_v38, %s2280_s19  ;;  %v2615_v8 = vpop.permute.xlu0 %591  ;;  %v2662_v38 = vsel %vm1766_vm14, 1, %v2281_v25 }
 0x766   :  { %vm593_vm13 = vcmp.eq.s32.totalorder %v2615_v8, 1 }
 0x767   :  { %v2684_v34 = vsel %vm593_vm13, %v2608_v6, %v2604_v58 }
 0x768   :  { %v2060_v44 = vpop.eup %2059 }
 0x769   :  { %582 = vrot.lane.b32.xlu0 %v2060_v44, %s2280_s19 }
 0x7d7   :  { %v678_v46 = vpop.permute.xlu1 %677 }
 0x7d8   :  { %v2617_v51 = vmul.f32 %v2054_v30, %v678_v46  ;;  %v2668_v46 = vsel %vm1762_vm15, 1, %v2281_v25 }
 0x7da   :  { %v2624_v10 = vsel %vm688_vm12, %v2617_v51, %v2540_v57 }
 0x7db   :  { %v583_v13 = vpop.permute.xlu0 %582  ;;  %v799_v14 = vpack.c.bf16 %v2624_v10, %v2624_v10 }
 0x7dc   :  { %v2628_v15 = vmul.f32 %v2056_v33, %v583_v13  ;;  %v2675_v13 = vsel %vm688_vm12, %v2598_v45, %v2595_v49 }
 0x7dd   :  { %801 = vrot.lane.b32.xlu1 %v799_v14, %s2275_s29 }
 0x7de   :  { %v2636_v16 = vsel %vm593_vm13, %v2628_v15, %v2552_v5  ;;  %v798_v5 = vunpack.c.l.bf16 %v2571_v63 }
 0x7df   :  { %v704_v57 = vpack.c.bf16 %v2636_v16, %v2636_v16 }
 0x7e1   :  { %706 = vrot.lane.b32.xlu0 %v704_v57, %s2275_s29 }
 0x84f   :  { %v802_v17 = vpop.permute.xlu1 %801 }
 0x850   :  { %1925 = vmatmul.mubr.msk.bf16.vlgmr.msra.gmra.mxu1 %vm79_vm0, %v802_v17 }
 0x851   :  { %1937 = vmatpush3.bf16.msra.mxu1 %v2365_v2  ;;  %1940 = vmatprep.mubr.msk.bf16.mxu1 %vm2279_vm1, %v2278_v0 }
 0x852   :  { %1938 = vmatprep.subr.bf16.mxu1 %v2278_v0 }
 0x853   :  { %v707_v18 = vpop.permute.xlu0 %706 }
 0x854   :  { %1917 = vmatmul.mubr.msk.bf16.vlgmr.msra.gmra.mxu0 %vm79_vm0, %v707_v18 }
 0x855   :  { %1939 = vmatpush3.bf16.msra.mxu1 %v2375_v4  ;;  %1929 = vmatpush3.bf16.msra.mxu0 %v2360_v1 }
 0x856   :  { %1930 = vmatprep.subr.bf16.mxu0 %v2278_v0  ;;  %1932 = vmatprep.mubr.msk.bf16.mxu0 %vm2279_vm1, %v2278_v0 }
 0x857   :  { %1952 = vmatprep.subr.bf16.mxu1 %v2278_v0 }
 0x859   :  { %1931 = vmatpush3.bf16.msra.mxu0 %v2368_v3 }
 0x85a   :  { %1944 = vmatprep.subr.bf16.mxu0 %v2278_v0 }
 0x910   :  { %v840_v19 = vpop.f32.mrf.mxu1 }
 0x911   :  { %v846_v20 = vadd.f32 %v840_v19, %v798_v5 }
 0x912   :  { %v1926_v22 = vpop.f32.mrf.mxu1 }
 0x913   :  { %2061 = vtanh.f32 %v846_v20  ;;  %v1765_v63 = vmul.f32 -1.442695, %v846_v20 }
 0x914   :  { %v745_v23 = vpop.f32.mrf.mxu0  ;;  %v843_v12 = vpop.f32.mrf.mxu1 }
 0x915   :  { %v751_v24 = vadd.f32 %v745_v23, %v703_v21 }
 0x916   :  { %v1918_v11 = vpop.f32.mrf.mxu0  ;;  %v1927_v26 = vpop.f32.mrf.mxu1 }
 0x917   :  { %2063 = vtanh.f32 %v751_v24  ;;  %v1761_v31 = vmul.f32 -1.442695, %v751_v24 }
 0x918   :  { %v748_v27 = vpop.f32.mrf.mxu0  ;;  %2065 = vpow2.f32 %v1765_v63 }
 0x919   :  { %2067 = vpow2.f32 %v1761_v31 }
 0x91a   :  { %v1919_v28 = vpop.f32.mrf.mxu0 }
 0x91b   :  { %v2738_v28 = vld [vmem:[#allocation6 + $0x10] sm:$0xff]  }
 0x91c   :  { %v893_v63 = vunpack.c.l.bf16 %v2738_v28 }
 0x920   :  { %v2062_v29 = vpop.eup %2061 }
 0x921   :  { %856 = vrot.lane.b32.xlu1 %v2062_v29, %s2280_s19 }
 0x924   :  { %v2064_v30 = vpop.eup %2063 }
 0x925   :  { %761 = vrot.lane.b32.xlu0 %v2064_v30, %s2280_s19  ;;  %v2066_v9 = vpop.eup %2065 }
 0x926   :  { %v850_v32 = vadd.f32 1.0, %v2066_v9  ;;  %v2068_v33 = vpop.eup %2067 }
 0x927   :  { %v755_v36 = vadd.f32 1.0, %v2068_v33 }
 0x928   :  { %2069 = vrcp.f32 %v850_v32 }
 0x929   :  { %2071 = vrcp.f32 %v755_v36 }
 0x935   :  { %v2070_v41 = vpop.eup %2069 }
 0x936   :  { %v2072_v60 = vpop.eup %2071  ;;  %v854_v14 = vmul.f32 %v2070_v41, %v2675_v13 }
 0x937   :  { %v759_v25 = vmul.f32 %v2072_v60, %v2684_v34 }
 0x993   :  { %v857_v43 = vpop.permute.xlu1 %856 }
 0x994   :  { %v859_v47 = vmul.f32 %v2070_v41, %v857_v43 }
 0x996   :  { %861 = vrot.lane.b32.xlu1 %v859_v47, %s2280_s19 }
 0x997   :  { %v762_v59 = vpop.permute.xlu0 %761 }
 0x998   :  { %v764_v44 = vmul.f32 %v2072_v60, %v762_v59 }
 0x99a   :  { %876 = vperm.xlu1 %2008, %v2662_v38   ;;  %766 = vrot.lane.b32.xlu0 %v764_v44, %s2280_s19 }
 0x99e   :  { %781 = vperm.xlu0 %2007, %v2668_v46  }
 0xa08   :  { %v862_v57 = vpop.permute.xlu1 %861 }
 0xa09   :  { %v2678_v17 = vadd.f32 %v862_v57, %v854_v14 }
 0xa0b   :  { %2073 = vtanh.f32 %v2678_v17 }
 0xa0c   :  { %v767_v18 = vpop.permute.xlu0 %766 }
 0xa0d   :  { %v2688_v5 = vadd.f32 %v767_v18, %v759_v25 }
 0xa0f   :  { %2075 = vtanh.f32 %v2688_v5 }
 0xa15   :  { %v2693_v19 = vpop.permute.xlu1 %876 }
 0xa16   :  { %vm878_vm2 = vcmp.eq.s32.totalorder %v2693_v19, 1 }
 0xa18   :  { %v2074_v49 = vpop.eup %2073 }
 0xa19   :  { %867 = vrot.lane.b32.xlu1 %v2074_v49, %s2280_s19  ;;  %v2695_v20 = vpop.permute.xlu0 %781 }
 0xa1a   :  { %vm783_vm3 = vcmp.eq.s32.totalorder %v2695_v20, 1 }
 0xa1c   :  { %v2076_v45 = vpop.eup %2075 }
 0xa1d   :  { %772 = vrot.lane.b32.xlu0 %v2076_v45, %s2280_s19 }
 0xa8b   :  { %v868_v58 = vpop.permute.xlu1 %867 }
 0xa8c   :  { %v2697_v6 = vmul.f32 %v2070_v41, %v868_v58 }
 0xa8e   :  { %v2704_v21 = vsel %vm878_vm2, %v2697_v6, %v2624_v10 }
 0xa8f   :  { %v773_v22 = vpop.permute.xlu0 %772  ;;  %v989_v23 = vpack.c.bf16 %v2704_v21, %v2704_v21 }
 0xa90   :  { %v2708_v12 = vmul.f32 %v2072_v60, %v773_v22 }
 0xa91   :  { %991 = vrot.lane.b32.xlu1 %v989_v23, %s2275_s29 }
 0xa92   :  { %v2716_v24 = vsel %vm783_vm3, %v2708_v12, %v2636_v16  ;;  %v2735_v16 = vld [vmem:[#allocation9 + $0x8] sm:$0xff]  }
 0xa93   :  { %v894_v10 = vpack.c.bf16 %v2716_v24, %v2716_v24  ;;  %v988_v27 = vunpack.c.h.bf16 %v2735_v16 }
 0xa95   :  { %896 = vrot.lane.b32.xlu0 %v894_v10, %s2275_s29 }
 0xb03   :  { %v992_v11 = vpop.permute.xlu1 %991 }
 0xb04   :  { %1941 = vmatmul.mubr.msk.bf16.vlgmr.msra.gmra.mxu1 %vm79_vm0, %v992_v11 }
 0xb05   :  { %1953 = vmatpush3.bf16.msra.mxu1 %v2365_v2  ;;  %1956 = vmatprep.mubr.msk.bf16.mxu1 %vm2279_vm1, %v2278_v0 }
 0xb06   :  { %1954 = vmatprep.subr.bf16.mxu1 %v2278_v0 }
 0xb07   :  { %v897_v26 = vpop.permute.xlu0 %896 }
 0xb08   :  { %1933 = vmatmul.mubr.msk.bf16.vlgmr.msra.gmra.mxu0 %vm79_vm0, %v897_v26  ;;  %v2751_v26 = vsel %vm878_vm2, %v2678_v17, %v2675_v13 }
 0xb09   :  { %1955 = vmatpush3.bf16.msra.mxu1 %v2375_v4  ;;  %1945 = vmatpush3.bf16.msra.mxu0 %v2360_v1 }
 0xb0a   :  { %1946 = vmatprep.subr.bf16.mxu0 %v2278_v0  ;;  %1948 = vmatprep.mubr.msk.bf16.mxu0 %vm2279_vm1, %v2278_v0 }
 0xb0b   :  { %1968 = vmatprep.subr.bf16.mxu1 %v2278_v0 }
 0xb0d   :  { %1947 = vmatpush3.bf16.msra.mxu0 %v2368_v3 }
 0xb0e   :  { %1960 = vmatprep.subr.bf16.mxu0 %v2278_v0 }
 0xbc4   :  { %v1030_v29 = vpop.f32.mrf.mxu1 }
 0xbc5   :  { %v1036_v30 = vadd.f32 %v1030_v29, %v988_v27 }
 0xbc6   :  { %v1942_v31 = vpop.f32.mrf.mxu1 }
 0xbc7   :  { %2077 = vtanh.f32 %v1036_v30  ;;  %v1773_v44 = vmul.f32 -1.442695, %v1036_v30 }
 0xbc8   :  { %v935_v9 = vpop.f32.mrf.mxu0  ;;  %v1033_v32 = vpop.f32.mrf.mxu1 }
 0xbc9   :  { %v941_v33 = vadd.f32 %v935_v9, %v893_v63 }
 0xbca   :  { %v1934_v36 = vpop.f32.mrf.mxu0  ;;  %v1943_v41 = vpop.f32.mrf.mxu1 }
 0xbcb   :  { %2079 = vtanh.f32 %v941_v33  ;;  %v1769_v14 = vmul.f32 -1.442695, %v941_v33 }
 0xbcc   :  { %v938_v43 = vpop.f32.mrf.mxu0  ;;  %2081 = vpow2.f32 %v1773_v44 }
 0xbcd   :  { %2083 = vpow2.f32 %v1769_v14  ;;  %v1083_v14 = vunpack.c.h.bf16 %v2738_v28 }
 0xbce   :  { %v1935_v47 = vpop.f32.mrf.mxu0 }
 0xbd4   :  { %v2078_v60 = vpop.eup %2077 }
 0xbd5   :  { %1046 = vrot.lane.b32.xlu1 %v2078_v60, %s2280_s19 }
 0xbd8   :  { %v2080_v59 = vpop.eup %2079 }
 0xbd9   :  { %951 = vrot.lane.b32.xlu0 %v2080_v59, %s2280_s19  ;;  %v2082_v57 = vpop.eup %2081 }
 0xbda   :  { %v1040_v25 = vadd.f32 1.0, %v2082_v57  ;;  %v2084_v18 = vpop.eup %2083 }
 0xbdb   :  { %v945_v49 = vadd.f32 1.0, %v2084_v18 }
 0xbdc   :  { %2085 = vrcp.f32 %v1040_v25 }
 0xbdd   :  { %2087 = vrcp.f32 %v945_v49 }
 0xbe9   :  { %v2086_v45 = vpop.eup %2085 }
 0xbea   :  { %v2088_v23 = vpop.eup %2087  ;;  %v1044_v27 = vmul.f32 %v2086_v45, %v2751_v26 }
 0xc47   :  { %v1047_v58 = vpop.permute.xlu1 %1046 }
 0xc48   :  { %v1049_v22 = vmul.f32 %v2086_v45, %v1047_v58 }
 0xc4a   :  { %1051 = vrot.lane.b32.xlu1 %v1049_v22, %s2280_s19 }
 0xc4b   :  { %v952_v10 = vpop.permute.xlu0 %951 }
 0xc4c   :  { %v954_v11 = vmul.f32 %v2088_v23, %v952_v10 }
 0xc4e   :  { %1066 = vperm.xlu1 %2008, %v2668_v46   ;;  %956 = vrot.lane.b32.xlu0 %v954_v11, %s2280_s19  ;;  %v2760_v46 = vsel %vm783_vm3, %v2688_v5, %v2684_v34 }
 0xc52   :  { %971 = vperm.xlu0 %2007, %v2662_v38   ;;  %v949_v38 = vmul.f32 %v2088_v23, %v2760_v46 }
 0xcbc   :  { %v1052_v29 = vpop.permute.xlu1 %1051 }
 0xcbd   :  { %v2754_v30 = vadd.f32 %v1052_v29, %v1044_v27 }
 0xcbf   :  { %2089 = vtanh.f32 %v2754_v30 }
 0xcc0   :  { %v957_v63 = vpop.permute.xlu0 %956 }
 0xcc1   :  { %v2764_v31 = vadd.f32 %v957_v63, %v949_v38 }
 0xcc3   :  { %2091 = vtanh.f32 %v2764_v31 }
 0xcc9   :  { %v2769_v9 = vpop.permute.xlu1 %1066 }
 0xcca   :  { %vm1068_vm6 = vcmp.eq.s32.totalorder %v2769_v9, 1  ;;  %v200_v9 = vsel %vm193_vm5, %v2465_v61, 0.0  ;;  %vm208_vm5 = vcmask 257024  }
 0xccc   :  { %v2090_v13 = vpop.eup %2089 }
 0xccd   :  { %1057 = vrot.lane.b32.xlu1 %v2090_v13, %s2280_s19  ;;  %v2771_v32 = vpop.permute.xlu0 %971 }
 0xcce   :  { %vm973_vm7 = vcmp.eq.s32.totalorder %v2771_v32, 1 }
 0xcd0   :  { %v2092_v17 = vpop.eup %2091 }
 0xcd1   :  { %962 = vrot.lane.b32.xlu0 %v2092_v17, %s2280_s19 }
 0xd3f   :  { %v1058_v34 = vpop.permute.xlu1 %1057 }
 0xd40   :  { %v2773_v5 = vmul.f32 %v2086_v45, %v1058_v34 }
 0xd42   :  { %v2780_v33 = vsel %vm1068_vm6, %v2773_v5, %v2704_v21  ;;  %v1071_v54 = vsel %vm1068_vm6, %v2773_v5, 0.0  ;;  %v406_v5 = vsel %vm403_vm9, %v2544_v62, 0.0 }
 0xd43   :  { %v963_v36 = vpop.permute.xlu0 %962  ;;  %v1179_v41 = vpack.c.bf16 %v2780_v33, %v2780_v33  ;;  %v1809_v52 = vpack.c.bf16 %v1071_v54, %v1071_v54 }
 0xd44   :  { %v2784_v43 = vmul.f32 %v2088_v23, %v963_v36  ;;  %v2823_v36 = vsel %vm1068_vm6, %v2754_v30, %v2751_v26 }
 0xd45   :  { %1181 = vrot.lane.b32.xlu1 %v1179_v41, %s2275_s29 }
 0xd46   :  { %v2792_v47 = vsel %vm973_vm7, %v2784_v43, %v2716_v24  ;;  %v976_v55 = vsel %vm973_vm7, %v2784_v43, 0.0 }
 0xd47   :  { %v1084_v21 = vpack.c.bf16 %v2792_v47, %v2792_v47  ;;  %v1808_v8 = vpack.c.bf16 %v976_v55, %v976_v55 }
 0xd49   :  { %1086 = vrot.lane.b32.xlu0 %v1084_v21, %s2275_s29 }
 0xdb7   :  { %v1182_v60 = vpop.permute.xlu1 %1181 }
 0xdb8   :  { %1957 = vmatmul.mubr.msk.bf16.vlgmr.msra.gmra.mxu1 %vm79_vm0, %v1182_v60 }
 0xdb9   :  { %1969 = vmatpush3.bf16.msra.mxu1 %v2365_v2  ;;  %1972 = vmatprep.mubr.msk.bf16.mxu1 %vm2279_vm1, %v2278_v0  ;;  %v1178_v2 = vunpack.c.l.bf16 %v2735_v16 }
 0xdba   :  { %1970 = vmatprep.subr.bf16.mxu1 %v2278_v0 }
 0xdbb   :  { %v1087_v59 = vpop.permute.xlu0 %1086 }
 0xdbc   :  { %1949 = vmatmul.mubr.msk.bf16.vlgmr.msra.gmra.mxu0 %vm79_vm0, %v1087_v59 }
 0xdbd   :  { %1971 = vmatpush3.bf16.msra.mxu1 %v2375_v4  ;;  %1961 = vmatpush3.bf16.msra.mxu0 %v2360_v1 }
 0xdbe   :  { %1962 = vmatprep.subr.bf16.mxu0 %v2278_v0  ;;  %1964 = vmatprep.mubr.msk.bf16.mxu0 %vm2279_vm1, %v2278_v0 }
 0xdbf   :  { %1984 = vmatprep.subr.bf16.mxu1 %v2278_v0 }
 0xdc1   :  { %1963 = vmatpush3.bf16.msra.mxu0 %v2368_v3 }
 0xdc2   :  { %1976 = vmatprep.subr.bf16.mxu0 %v2278_v0 }
 0xe78   :  { %v1220_v24 = vpop.f32.mrf.mxu1 }
 0xe79   :  { %v1226_v44 = vadd.f32 %v1220_v24, %v1178_v2 }
 0xe7a   :  { %v1958_v4 = vpop.f32.mrf.mxu1 }
 0xe7b   :  { %2093 = vtanh.f32 %v1226_v44  ;;  %v1781_v16 = vmul.f32 -1.442695, %v1226_v44 }
 0xe7c   :  { %v1125_v1 = vpop.f32.mrf.mxu0  ;;  %v1223_v57 = vpop.f32.mrf.mxu1 }
 0xe7d   :  { %v1131_v25 = vadd.f32 %v1125_v1, %v1083_v14 }
 0xe7e   :  { %v1950_v18 = vpop.f32.mrf.mxu0  ;;  %v1959_v49 = vpop.f32.mrf.mxu1 }
 0xe7f   :  { %2095 = vtanh.f32 %v1131_v25  ;;  %v1777_v23 = vmul.f32 -1.442695, %v1131_v25  ;;  %v2141_v49 = vld [vmem:[%s3104_s4 + $0x8] sm:$0xff]  }
 0xe80   :  { %v1128_v45 = vpop.f32.mrf.mxu0  ;;  %2097 = vpow2.f32 %v1781_v16 }
 0xe81   :  { %2099 = vpow2.f32 %v1777_v23  ;;  %v2142_v45 = vld [vmem:[%s3104_s4] sm:$0xff]   ;;  %v2886_v23 = vld [vmem:[#allocation6 + $0x18] sm:$0xff]   ;;  %s2282_s4 = smov 96  }
 0xe82   :  { %v1951_v58 = vpop.f32.mrf.mxu0 }
 0xe83   :  { %v2143_v58 = vld [vmem:[#allocation11 + $0x8] sm:$0xff]  }
 0xe88   :  { %v2094_v22 = vpop.eup %2093 }
 0xe89   :  { %1236 = vrot.lane.b32.xlu1 %v2094_v22, %s2280_s19  ;;  %v2144_v22 = vld [vmem:[#allocation11] sm:$0xff]  }
 0xe8c   :  { %v2096_v3 = vpop.eup %2095 }
 0xe8d   :  { %1141 = vrot.lane.b32.xlu0 %v2096_v3, %s2280_s19  ;;  %v2098_v28 = vpop.eup %2097  ;;  %v2883_v3 = vld [vmem:[#allocation9] sm:$0xff]  }
 0xe8e   :  { %v1230_v10 = vadd.f32 1.0, %v2098_v28  ;;  %v2100_v11 = vpop.eup %2099  ;;  %v1368_v16 = vunpack.c.h.bf16 %v2883_v3 }
 0xe8f   :  { %v1135_v27 = vadd.f32 1.0, %v2100_v11  ;;  %v1273_v11 = vunpack.c.l.bf16 %v2886_v23 }
 0xe90   :  { %2101 = vrcp.f32 %v1230_v10 }
 0xe91   :  { %2103 = vrcp.f32 %v1135_v27 }
 0xe9d   :  { %v2102_v29 = vpop.eup %2101 }
 0xe9e   :  { %v2104_v13 = vpop.eup %2103  ;;  %v1234_v41 = vmul.f32 %v2102_v29, %v2823_v36 }
 0xefb   :  { %v1237_v38 = vpop.permute.xlu1 %1236 }
 0xefc   :  { %v1239_v63 = vmul.f32 %v2102_v29, %v1237_v38 }
 0xefe   :  { %1241 = vrot.lane.b32.xlu1 %v1239_v63, %s2280_s19 }
 0xeff   :  { %v1142_v17 = vpop.permute.xlu0 %1141 }
 0xf00   :  { %v1144_v34 = vmul.f32 %v2104_v13, %v1142_v17 }
 0xf02   :  { %1256 = vperm.xlu1 %2008, %v2588_v48   ;;  %1146 = vrot.lane.b32.xlu0 %v1144_v34, %s2280_s19  ;;  %v2832_v48 = vsel %vm973_vm7, %v2764_v31, %v2760_v46 }
 0xf06   :  { %1161 = vperm.xlu0 %2007, %v2582_v39   ;;  %v1139_v39 = vmul.f32 %v2104_v13, %v2832_v48 }
 0xf70   :  { %v1242_v21 = vpop.permute.xlu1 %1241 }
 0xf71   :  { %v2826_v60 = vadd.f32 %v1242_v21, %v1234_v41 }
 0xf73   :  { %2105 = vtanh.f32 %v2826_v60 }
 0xf74   :  { %v1147_v59 = vpop.permute.xlu0 %1146 }
 0xf75   :  { %v2836_v2 = vadd.f32 %v1147_v59, %v1139_v39 }
 0xf77   :  { %2107 = vtanh.f32 %v2836_v2 }
 0xf7d   :  { %v2841_v24 = vpop.permute.xlu1 %1256 }
 0xf7e   :  { %vm1258_vm10 = vcmp.eq.s32.totalorder %v2841_v24, 1  ;;  %v1800_v24 = vpack.c.bf16 %v200_v9, %v200_v9 }
 0xf80   :  { %v2106_v26 = vpop.eup %2105 }
 0xf81   :  { %1247 = vrot.lane.b32.xlu1 %v2106_v26, %s2280_s19  ;;  %v2843_v44 = vpop.permute.xlu0 %1161 }
 0xf82   :  { %vm1163_vm11 = vcmp.eq.s32.totalorder %v2843_v44, 1 }
 0xf84   :  { %v2108_v30 = vpop.eup %2107 }
 0xf85   :  { %1152 = vrot.lane.b32.xlu0 %v2108_v30, %s2280_s19 }
 0xff3   :  { %v1248_v46 = vpop.permute.xlu1 %1247 }
 0xff4   :  { %v2845_v31 = vmul.f32 %v2102_v29, %v1248_v46 }
 0xff6   :  { %v2852_v14 = vsel %vm1258_vm10, %v2845_v31, %v2780_v33 }
 0xff7   :  { %v1153_v4 = vpop.permute.xlu0 %1152  ;;  %v1369_v1 = vpack.c.bf16 %v2852_v14, %v2852_v14 }
 0xff8   :  { %v2856_v57 = vmul.f32 %v2104_v13, %v1153_v4 }
 0xff9   :  { %1371 = vrot.lane.b32.xlu1 %v1369_v1, %s2275_s29 }
 0xffa   :  { %v2864_v25 = vsel %vm1163_vm11, %v2856_v57, %v2792_v47  ;;  %v1166_v62 = vsel %vm1163_vm11, %v2856_v57, 0.0 }
 0xffb   :  { %v1274_v33 = vpack.c.bf16 %v2864_v25, %v2864_v25 }
 0xffd   :  { %1276 = vrot.lane.b32.xlu0 %v1274_v33, %s2275_s29 }
0x106b   :  { %v1372_v18 = vpop.permute.xlu1 %1371 }
0x106c   :  { %1973 = vmatmul.mubr.msk.bf16.vlgmr.msra.gmra.mxu1 %vm79_vm0, %v1372_v18 }
0x106d   :  { %1985 = vmatpush3.bf16.msra.mxu1 %v2141_v49  ;;  %1988 = vmatprep.mubr.msk.bf16.mxu1 %vm2279_vm1, %v2278_v0 }
0x106e   :  { %1986 = vmatprep.subr.bf16.mxu1 %v2278_v0 }
0x106f   :  { %v1277_v47 = vpop.permute.xlu0 %1276 }
0x1070   :  { %1965 = vmatmul.mubr.msk.bf16.vlgmr.msra.gmra.mxu0 %vm79_vm0, %v1277_v47 }
0x1071   :  { %1987 = vmatpush3.bf16.msra.mxu1 %v2142_v45  ;;  %1977 = vmatpush3.bf16.msra.mxu0 %v2143_v58  ;;  %v2899_v58 = vsel %vm1258_vm10, %v2826_v60, %v2823_v36 }
0x1072   :  { %1978 = vmatprep.subr.bf16.mxu0 %v2278_v0  ;;  %1980 = vmatprep.mubr.msk.bf16.mxu0 %vm2279_vm1, %v2278_v0 }
0x1075   :  { %1979 = vmatpush3.bf16.msra.mxu0 %v2144_v22 }
0x112c   :  { %v1410_v28 = vpop.f32.mrf.mxu1 }
0x112d   :  { %v1416_v10 = vadd.f32 %v1410_v28, %v1368_v16 }
0x112e   :  { %v1974_v27 = vpop.f32.mrf.mxu1 }
0x112f   :  { %2109 = vtanh.f32 %v1416_v10  ;;  %v1789_v39 = vmul.f32 -1.442695, %v1416_v10 }
0x1130   :  { %v1315_v29 = vpop.f32.mrf.mxu0  ;;  %v1413_v38 = vpop.f32.mrf.mxu1 }
0x1131   :  { %v1321_v63 = vadd.f32 %v1315_v29, %v1273_v11 }
0x1132   :  { %v1966_v13 = vpop.f32.mrf.mxu0  ;;  %v1975_v17 = vpop.f32.mrf.mxu1 }
0x1133   :  { %2111 = vtanh.f32 %v1321_v63  ;;  %v1785_v59 = vmul.f32 -1.442695, %v1321_v63 }
0x1134   :  { %v1318_v0 = vpop.f32.mrf.mxu0  ;;  %2113 = vpow2.f32 %v1789_v39 }
0x1135   :  { %2115 = vpow2.f32 %v1785_v59 }
0x1136   :  { %v1967_v34 = vpop.f32.mrf.mxu0 }
0x113c   :  { %v2110_v41 = vpop.eup %2109 }
0x113d   :  { %1426 = vrot.lane.b32.xlu1 %v2110_v41, %s2280_s19 }
0x1140   :  { %v2112_v21 = vpop.eup %2111 }
0x1141   :  { %1331 = vrot.lane.b32.xlu0 %v2112_v21, %s2280_s19  ;;  %v2114_v26 = vpop.eup %2113  ;;  %v1557_v21 = vunpack.c.l.bf16 %v2883_v3 }
0x1142   :  { %v1420_v30 = vadd.f32 1.0, %v2114_v26  ;;  %v2116_v46 = vpop.eup %2115  ;;  %v1463_v26 = vunpack.c.h.bf16 %v2886_v23 }
0x1143   :  { %v1325_v4 = vadd.f32 1.0, %v2116_v46 }
0x1144   :  { %2117 = vrcp.f32 %v1420_v30 }
0x1145   :  { %2119 = vrcp.f32 %v1325_v4 }
0x1151   :  { %v2118_v1 = vpop.eup %2117 }
0x1152   :  { %v2120_v49 = vpop.eup %2119  ;;  %v1424_v22 = vmul.f32 %v2118_v1, %v2899_v58 }
0x11af   :  { %v1427_v33 = vpop.permute.xlu1 %1426 }
0x11b0   :  { %v1429_v18 = vmul.f32 %v2118_v1, %v1427_v33 }
0x11b2   :  { %1431 = vrot.lane.b32.xlu1 %v1429_v18, %s2280_s19 }
0x11b3   :  { %v1332_v47 = vpop.permute.xlu0 %1331 }
0x11b4   :  { %v1334_v45 = vmul.f32 %v2120_v49, %v1332_v47 }
0x11b6   :  { %1446 = vperm.xlu1 %2008, %v2504_v37   ;;  %1336 = vrot.lane.b32.xlu0 %v1334_v45, %s2280_s19  ;;  %v2908_v37 = vsel %vm1163_vm11, %v2836_v2, %v2832_v48 }
0x11ba   :  { %1351 = vperm.xlu0 %2007, %v2498_v35   ;;  %v1329_v35 = vmul.f32 %v2120_v49, %v2908_v37 }
0x1224   :  { %v1432_v16 = vpop.permute.xlu1 %1431 }
0x1225   :  { %v2902_v28 = vadd.f32 %v1432_v16, %v1424_v22 }
0x1227   :  { %2121 = vtanh.f32 %v2902_v28 }
0x1228   :  { %v1337_v10 = vpop.permute.xlu0 %1336 }
0x1229   :  { %v2912_v11 = vadd.f32 %v1337_v10, %v1329_v35 }
0x122b   :  { %2123 = vtanh.f32 %v2912_v11 }
0x1231   :  { %v2917_v27 = vpop.permute.xlu1 %1446 }
0x1232   :  { %vm1448_vm1 = vcmp.eq.s32.totalorder %v2917_v27, 1  ;;  %v596_v27 = vsel %vm593_vm13, %v2628_v15, 0.0  ;;  %v1810_v15 = vpack.c.bf16 %v1166_v62, %v1166_v62 }
0x1233   :  { %v1804_v53 = vpack.c.bf16 %v596_v27, %v596_v27 }
0x1234   :  { %v2122_v36 = vpop.eup %2121 }
0x1235   :  { %1437 = vrot.lane.b32.xlu1 %v2122_v36, %s2280_s19  ;;  %v2919_v29 = vpop.permute.xlu0 %1351 }
0x1236   :  { %vm1353_vm14 = vcmp.eq.s32.totalorder %v2919_v29, 1 }
0x1238   :  { %v2124_v60 = vpop.eup %2123 }
0x1239   :  { %1342 = vrot.lane.b32.xlu0 %v2124_v60, %s2280_s19 }
0x12a7   :  { %v1438_v48 = vpop.permute.xlu1 %1437 }
0x12a8   :  { %v2921_v2 = vmul.f32 %v2118_v1, %v1438_v48 }
0x12aa   :  { %v2928_v38 = vsel %vm1448_vm1, %v2921_v2, %v2852_v14  ;;  %v1451_v7 = vsel %vm1448_vm1, %v2921_v2, 0.0  ;;  %v786_v2 = vsel %vm783_vm3, %v2708_v12, 0.0 }
0x12ab   :  { %v1343_v63 = vpop.permute.xlu0 %1342  ;;  %v1558_v13 = vpack.c.bf16 %v2928_v38, %v2928_v38  ;;  %v1813_v19 = vpack.c.bf16 %v1451_v7, %v1451_v7  ;;  %v1806_v61 = vpack.c.bf16 %v786_v2, %v786_v2 }
0x12ac   :  { %v2932_v17 = vmul.f32 %v2120_v49, %v1343_v63 }
0x12ad   :  { %1560 = vrot.lane.b32.xlu1 %v1558_v13, %s2275_s29 }
0x12ae   :  { %v2940_v0 = vsel %vm1353_vm14, %v2932_v17, %v2864_v25  ;;  %v1356_v20 = vsel %vm1353_vm14, %v2932_v17, 0.0 }
0x12af   :  { %v1464_v14 = vpack.c.bf16 %v2940_v0, %v2940_v0  ;;  %v1812_v12 = vpack.c.bf16 %v1356_v20, %v1356_v20 }
0x12b1   :  { %1466 = vrot.lane.b32.xlu0 %v1464_v14, %s2275_s29 }
0x131f   :  { %v1561_v34 = vpop.permute.xlu1 %1560 }
0x1320   :  { %1989 = vmatmul.mubr.msk.bf16.vlgmr.msra.gmra.mxu1 %vm79_vm0, %v1561_v34  ;;  %v2965_v34 = vsel %vm1448_vm1, %v2902_v28, %v2899_v58 }
0x1323   :  { %v1467_v41 = vpop.permute.xlu0 %1466 }
0x1324   :  { %1981 = vmatmul.mubr.msk.bf16.vlgmr.msra.gmra.mxu0 %vm79_vm0, %v1467_v41 }
0x13e0   :  { %v1599_v39 = vpop.f32.mrf.mxu1 }
0x13e1   :  { %v1605_v59 = vadd.f32 %v1599_v39, %v1557_v21 }
0x13e2   :  { %v1990_v30 = vpop.f32.mrf.mxu1 }
0x13e3   :  { %2125 = vtanh.f32 %v1605_v59  ;;  %v1797_v3 = vmul.f32 -1.442695, %v1605_v59 }
0x13e4   :  { %v1505_v25 = vpop.f32.mrf.mxu0  ;;  %v1602_v46 = vpop.f32.mrf.mxu1 }
0x13e5   :  { %v1511_v4 = vadd.f32 %v1505_v25, %v1463_v26  ;;  %v311_v26 = vsel %vm304_vm4, %v2455_v56, 0.0  ;;  %v501_v25 = vsel %vm498_vm8, %v2533_v50, 0.0  ;;  %v881_v56 = vsel %vm878_vm2, %v2697_v6, 0.0 }
0x13e6   :  { %v1982_v1 = vpop.f32.mrf.mxu0  ;;  %v1991_v33 = vpop.f32.mrf.mxu1  ;;  %v1801_v30 = vpack.c.bf16 %v311_v26, %v311_v26  ;;  %v1807_v50 = vpack.c.bf16 %v881_v56, %v881_v56 }
0x13e7   :  { %2127 = vtanh.f32 %v1511_v4  ;;  %v1793_v22 = vmul.f32 -1.442695, %v1511_v4  ;;  %v1803_v4 = vpack.c.bf16 %v501_v25, %v501_v25 }
0x13e8   :  { %v1508_v18 = vpop.f32.mrf.mxu0  ;;  %2129 = vpow2.f32 %v1797_v3 }
0x13e9   :  { %2131 = vpow2.f32 %v1793_v22 }
0x13ea   :  { %v1983_v49 = vpop.f32.mrf.mxu0 }
0x13f0   :  { %v2126_v47 = vpop.eup %2125 }
0x13f1   :  { %1615 = vrot.lane.b32.xlu1 %v2126_v47, %s2280_s19 }
0x13f4   :  { %v2128_v45 = vpop.eup %2127 }
0x13f5   :  { %1521 = vrot.lane.b32.xlu0 %v2128_v45, %s2280_s19  ;;  %v2130_v23 = vpop.eup %2129 }
0x13f6   :  { %v1609_v16 = vadd.f32 1.0, %v2130_v23  ;;  %v2132_v35 = vpop.eup %2131 }
0x13f7   :  { %v1515_v10 = vadd.f32 1.0, %v2132_v35 }
0x13f8   :  { %2133 = vrcp.f32 %v1609_v16 }
0x13f9   :  { %2135 = vrcp.f32 %v1515_v10 }
0x1405   :  { %v2951_v36 = vpop.eup %2133 }
0x1406   :  { %v2955_v63 = vpop.eup %2135  ;;  %v1613_v41 = vmul.f32 %v2951_v36, %v2965_v34 }
0x1463   :  { %v1616_v60 = vpop.permute.xlu1 %1615 }
0x1464   :  { %v1618_v48 = vmul.f32 %v2951_v36, %v1616_v60 }
0x1466   :  { %1620 = vrot.lane.b32.xlu1 %v1618_v48, %s2280_s19 }
0x1467   :  { %v1522_v13 = vpop.permute.xlu0 %1521 }
0x1468   :  { %v1524_v14 = vmul.f32 %v2955_v63, %v1522_v13 }
0x146a   :  { %1635 = vperm.xlu1 %2008, %v2430_v42   ;;  %1526 = vrot.lane.b32.xlu0 %v1524_v14, %s2280_s19  ;;  %v2975_v42 = vsel %vm1353_vm14, %v2912_v11, %v2908_v37  ;;  %v691_v11 = vsel %vm688_vm12, %v2617_v51, 0.0  ;;  %v1261_v51 = vsel %vm1258_vm10, %v2845_v31, 0.0  ;;  %v1802_v31 = vpack.c.bf16 %v406_v5, %v406_v5 }
0x146b   :  { %v1805_v46 = vpack.c.bf16 %v691_v11, %v691_v11  ;;  %v1811_v6 = vpack.c.bf16 %v1261_v51, %v1261_v51 }
0x146e   :  { %1541 = vperm.xlu0 %2007, %v2424_v40   ;;  %v1519_v40 = vmul.f32 %v2955_v63, %v2975_v42 }
0x14d8   :  { %v1621_v21 = vpop.permute.xlu1 %1620 }
0x14d9   :  { %v2969_v39 = vadd.f32 %v1621_v21, %v1613_v41 }
0x14db   :  { %2137 = vtanh.f32 %v2969_v39 }
0x14dc   :  { %v1527_v59 = vpop.permute.xlu0 %1526 }
0x14dd   :  { %v2980_v58 = vadd.f32 %v1527_v59, %v1519_v40 }
0x14df   :  { %2139 = vtanh.f32 %v2980_v58 }
0x14e5   :  { %v1636_v32 = vpop.permute.xlu1 %1635 }
0x14e6   :  { %vm1637_vm4 = vcmp.eq.s32.totalorder %v1636_v32, 1 }
0x14e7   :  { %v1639_v35 = vsel %vm1637_vm4, %v2969_v39, %v2965_v34 }
0x14e8   :  { %v2138_v28 = vpop.eup %2137 }
0x14e9   :  { %1626 = vrot.lane.b32.xlu1 %v2138_v28, %s2280_s19  ;;  %v1542_v43 = vpop.permute.xlu0 %1541 }
0x14ea   :  { %vm1543_vm8 = vcmp.eq.s32.totalorder %v1542_v43, 1 }
0x14eb   :  { %v1545_v23 = vsel %vm1543_vm8, %v2980_v58, %v2975_v42 }
0x14ec   :  { %v2140_v37 = vpop.eup %2139 }
0x14ed   :  { %316 = vrot.lane.b32.xlu1 %v1801_v30, %s2275_s29  ;;  %1532 = vrot.lane.b32.xlu0 %v2140_v37, %s2280_s19 }
0x14f1   :  { %696 = vrot.lane.b32.xlu1 %v1805_v46, %s2275_s29  ;;  %506 = vrot.lane.b32.xlu0 %v1803_v4, %s2275_s29 }
0x14f5   :  { %1076 = vrot.lane.b32.xlu1 %v1809_v52, %s2275_s29  ;;  %886 = vrot.lane.b32.xlu0 %v1807_v50, %s2275_s29 }
0x14f9   :  { %1456 = vrot.lane.b32.xlu1 %v1813_v19, %s2275_s29  ;;  %1266 = vrot.lane.b32.xlu0 %v1811_v6, %s2275_s29 }
0x14fd   :  { %205 = vrot.lane.b32.xlu1 %v1800_v24, %s2275_s29  ;;  %411 = vrot.lane.b32.xlu0 %v1802_v31, %s2275_s29 }
0x1501   :  { %601 = vrot.lane.b32.xlu1 %v1804_v53, %s2275_s29  ;;  %791 = vrot.lane.b32.xlu0 %v1806_v61, %s2275_s29 }
0x1505   :  { %981 = vrot.lane.b32.xlu1 %v1808_v8, %s2275_s29  ;;  %1171 = vrot.lane.b32.xlu0 %v1810_v15, %s2275_s29 }
0x1509   :  { %1361 = vrot.lane.b32.xlu1 %v1812_v12, %s2275_s29 }
0x155b   :  { %v1627_v44 = vpop.permute.xlu1 %1626 }
0x155c   :  { %v1629_v57 = vmul.f32 %v2951_v36, %v1627_v44 }
0x155e   :  { %v1638_v1 = vsel %vm1637_vm4, %v1629_v57, %v2928_v38  ;;  %v1640_v29 = vsel %vm1637_vm4, %v1629_v57, 0.0 }
0x155f   :  { %v317_v17 = vpop.permute.xlu1 %316  ;;  %1660 = vrot.lane.b32.xlu0 %v1638_v1, %s2275_s29  ;;  %v1533_v33 = vpop.permute.xlu0 %1532  ;;  %v1815_v49 = vpack.c.bf16 %v1640_v29, %v1640_v29 }
0x1560   :  { %320 = vst.msk [vmem:[#allocation13 + $0x1c] sm:$0xf] %vm208_vm5, %v317_v17  ;;  %v1535_v18 = vmul.f32 %v2955_v63, %v1533_v33 }
0x1562   :  { %v1546_v47 = vsel %vm1543_vm8, %v1535_v18, 0.0  ;;  %v1544_v45 = vsel %vm1543_vm8, %v1535_v18, %v2940_v0 }
0x1563   :  { %v697_v3 = vpop.permute.xlu1 %696  ;;  %1645 = vrot.lane.b32.xlu0 %v1815_v49, %s2275_s29  ;;  %1650 = vrot.lane.b32.xlu1 %v1544_v45, %s2275_s29  ;;  %v507_v38 = vpop.permute.xlu0 %506  ;;  %v1814_v22 = vpack.c.bf16 %v1546_v47, %v1546_v47 }
0x1564   :  { %700 = vst.msk [vmem:[#allocation13 + $0x14] sm:$0xf] %vm208_vm5, %v697_v3  ;;  %510 = vst.msk [vmem:[#allocation13 + $0x18] sm:$0xf] %vm208_vm5, %v507_v38 }
0x1567   :  { %v1077_v16 = vpop.permute.xlu1 %1076  ;;  %1551 = vrot.lane.b32.xlu0 %v1814_v22, %s2275_s29  ;;  %1655 = vrot.lane.b32.xlu1 %v1545_v23, %s2282_s4  ;;  %v887_v0 = vpop.permute.xlu0 %886 }
0x1568   :  { %1080 = vst.msk [vmem:[#allocation13 + $0xc] sm:$0xf] %vm208_vm5, %v1077_v16  ;;  %890 = vst.msk [vmem:[#allocation13 + $0x10] sm:$0xf] %vm208_vm5, %v887_v0 }
0x156b   :  { %v1457_v10 = vpop.permute.xlu1 %1456  ;;  %1665 = vrot.lane.b32.xlu0 %v1639_v35, %s2282_s4  ;;  %v1267_v36 = vpop.permute.xlu0 %1266 }
0x156c   :  { %1460 = vst.msk [vmem:[#allocation13 + $0x4] sm:$0xf] %vm208_vm5, %v1457_v10  ;;  %1270 = vst.msk [vmem:[#allocation13 + $0x8] sm:$0xf] %vm208_vm5, %v1267_v36 }
0x156f   :  { %v206_v60 = vpop.permute.xlu1 %205  ;;  %v412_v48 = vpop.permute.xlu0 %411 }
0x1570   :  { %209 = vst.msk [vmem:[#allocation12] sm:$0xf] %vm208_vm5, %v206_v60  ;;  %415 = vst.msk [vmem:[#allocation12 + $0x4] sm:$0xf] %vm208_vm5, %v412_v48 }
0x1573   :  { %v602_v63 = vpop.permute.xlu1 %601  ;;  %v792_v13 = vpop.permute.xlu0 %791 }
0x1574   :  { %605 = vst.msk [vmem:[#allocation12 + $0x8] sm:$0xf] %vm208_vm5, %v602_v63  ;;  %795 = vst.msk [vmem:[#allocation12 + $0xc] sm:$0xf] %vm208_vm5, %v792_v13 }
0x1577   :  { %v982_v14 = vpop.permute.xlu1 %981  ;;  %v1172_v34 = vpop.permute.xlu0 %1171 }
0x1578   :  { %985 = vst.msk [vmem:[#allocation12 + $0x10] sm:$0xf] %vm208_vm5, %v982_v14  ;;  %1175 = vst.msk [vmem:[#allocation12 + $0x14] sm:$0xf] %vm208_vm5, %v1172_v34 }
0x157b   :  { %v1362_v41 = vpop.permute.xlu1 %1361 }
0x157c   :  { %1365 = vst.msk [vmem:[#allocation12 + $0x18] sm:$0xf] %vm208_vm5, %v1362_v41 }
0x15d1   :  { %v1661_v21 = vpop.permute.xlu0 %1660 }
0x15d2   :  { %1663 = vst.msk [vmem:[#allocation4] sm:$0xff] %vm79_vm0, %v1661_v21  ;;  %1674 = vst.msk [vmem:[#allocation15 + $0x8] sm:$0xff] %vm79_vm0, %v1661_v21 }
0x15d5   :  { %v1651_v39 = vpop.permute.xlu1 %1650  ;;  %v1646_v42 = vpop.permute.xlu0 %1645 }
0x15d6   :  { %1653 = vst.msk [vmem:[#allocation2] sm:$0xff] %vm79_vm0, %v1651_v39  ;;  %1672 = vst.msk [vmem:[#allocation15] sm:$0xff] %vm79_vm0, %v1651_v39 }
0x15d7   :  { %1648 = vst.msk [vmem:[#allocation13] sm:$0xf] %vm208_vm5, %v1646_v42 }
0x15d8   :  { %2216 = shalt.err (!%p2213_p5)
}
0x15d9   :  { %1702 = dma.vmem_to_hbm [thread:$0]  %s1697_s26, 512, %s3106_s6, [#allocation14], %s2275_s29, %s2275_s29, %s2276_s30  }
0x15da   :  { %s2225_s13 = scalar_lea.vmem %s1709_s28, 256  ;;  %p2230_p7 = scmp.lt.s32.totalorder %s1709_s28, %s1709_s28 }
0x15db   :  { %p2226_p6 = scmp.ne.s32.totalorder %s1709_s28, %s2225_s13  ;;  %p2231_p8 = scmp.lt.s32.totalorder %s2225_s13, %s2225_s13 }
0x15dd   :  { %p2232_p9 = por %p2231_p8, %p2230_p7 }
0x15df   :  { %p2233_p10 = pnand %p2232_p9, %p2226_p6 }
0x15e1   :  { %2236 = shalt.err (!%p2233_p10)
}
0x15e2   :  { %s2286_s14 = smov 128   ;;  %s2287_s15 = smov 8   ;;  %v1656_v40 = vpop.permute.xlu1 %1655  ;;  %v1552_v59 = vpop.permute.xlu0 %1551 }
0x15e3   :  { %1714 = dma.vmem_to_hbm [thread:$0]  %s1709_s28, 256, %s3107_s7, [#allocation14], %s2286_s14, %s2286_s14, %s2287_s15   ;;  %1658 = vst.msk [vmem:[#allocation3] sm:$0xff] %vm79_vm0, %v1656_v40 }
0x15e4   :  { %1555 = vst.msk [vmem:[#allocation12 + $0x1c] sm:$0xf] %vm208_vm5, %v1552_v59  ;;  %s2245_s6 = scalar_lea.vmem %s3075_s9, 512  ;;  %p2250_p12 = scmp.lt.s32.totalorder %s3075_s9, %s3075_s9 }
0x15e5   :  { %p2246_p11 = scmp.ne.s32.totalorder %s3075_s9, %s2245_s6  ;;  %p2251_p13 = scmp.lt.s32.totalorder %s2245_s6, %s2245_s6 }
0x15e7   :  { %p2252_p0 = por %p2251_p13, %p2250_p12 }
0x15e9   :  { %p2253_p1 = pnand %p2252_p0, %p2246_p11 }
0x15eb   :  { %2256 = shalt.err (!%p2253_p1)
}
0x15ec   :  { %1686 = dma.vmem_to_hbm [thread:$0]  %s3075_s9, 512, %s3105_s5, [#allocation8], %s2275_s29, %s2275_s29, %s2276_s30   ;;  %v1666_v58 = vpop.permute.xlu0 %1665 }
0x15ed   :  { %1668 = vst.msk [vmem:[#allocation5] sm:$0xff] %vm79_vm0, %v1666_v58 }
0x15ee   :  { %2269 = dma.done.wait [#allocation8], 512  }
0x15ef   :  { %2270 = vsyncadd [#allocation8], 4294966784 }
0x15f0   :  { %2271 = dma.done.wait [#allocation14], 768  }
0x15f1   :  { %2272 = vsyncadd [#allocation14], 4294966528 }
0x15f2   :  { %1724 = vsyncpa [#allocation7], 1 }
0x15f3   :  { %1725 = vsyncpa [#allocation10], 1 }
0x15f4   :  { %1726 = vsyncpa [#allocation8], 1 }
0x15f5   :  { %1727 = vsyncpa [#allocation14], 1 }

</bundles_post_ra>
